<compile_context>
chip_gen: v6e
topology: v6e:2x2x1
jax: 0.10.0
libtpu: 0.0.40
codegen_flags: <defaults>
</compile_context>

<pallas_src>
import functools

import jax
import jax.numpy as jnp
from jax.experimental import pallas as pl
from jax.experimental.pallas import tpu as pltpu


def _round_up(v, m):
    return ((v + m - 1) // m) * m


def _aspp_kernel(x_ref, w_ref, scale_ref, shift_ref, o_ref, *,
                 n_rows_in, n_rows_out, row_stride, KH, KW, dilation):
    """One (batch, Cout-tile, Cin-tile) grid step.

    x_ref:     (Lpad, TC)          flattened zero-padded NHWC activations (bf16)
    w_ref:     (KH*KW, TC, TCout)  conv weights, one (TC, TCout) mat per tap (bf16)
    scale_ref: (1, TCout)          folded BN scale (f32)
    shift_ref: (1, TCout)          folded BN shift (f32)
    o_ref:     (n_rows_out, TCout) lane-dense f32 output block; doubles as the
                                   Cin-reduction accumulator (resident across ci).
    """
    ci = pl.program_id(2)

    total = None
    for kj in range(KW):
        # One contiguous sublane-offset slice per kj realizes the column shift
        # (Mosaic realigns with sublane rotates on load; no per-tap strided
        # window gather + reshape copies).
        xs = x_ref[kj * dilation: kj * dilation + n_rows_in, :]
        for ki in range(KH):
            r0 = ki * dilation * row_stride          # multiple of 8 -> free slice
            lhs = xs[r0:r0 + n_rows_out, :]
            part = jnp.dot(lhs, w_ref[ki * KW + kj],
                           preferred_element_type=jnp.float32)
            total = part if total is None else total + part

    # Exactly one accumulator read-modify-write of o_ref per grid step.
    @pl.when(ci == 0)
    def _init():
        o_ref[...] = total

    @pl.when(ci > 0)
    def _accumulate():
        o_ref[...] += total

    @pl.when(ci == pl.num_programs(2) - 1)
    def _finalize():
        # Fused eval-mode BatchNorm (folded scale/shift) + ReLU, in place.
        y = o_ref[...] * scale_ref[...] + shift_ref[...]
        o_ref[...] = jnp.maximum(y, 0.0)


def aspp_module_forward(x_nchw, weight_oihw, bn_gamma, bn_beta,
                        bn_mean, bn_var, *, dilation, padding, eps=1e-5):
    """Pallas implementation of _ASPPModule.forward (stride=1 atrous conv).

    x_nchw:      (N, Cin, H, W)    float32
    weight_oihw: (Cout, Cin, KH, KW)
    returns:     (N, Cout, Hout, Wout)  float32
    """
    N, Cin, H, W = x_nchw.shape
    Cout, _, KH, KW = weight_oihw.shape

    Hout = H + 2 * padding - dilation * (KH - 1)
    Wout = W + 2 * padding - dilation * (KW - 1)
    assert Hout > 0 and Wout > 0, "invalid padding/dilation for this input size"

    LANE, SUB = 128, 8
    Hp, Wp = H + 2 * padding, W + 2 * padding
    Wpp = _round_up(Wp, SUB)           # row stride; makes the H->sublane flatten layout-free
    n_rows_in = Hp * Wpp
    n_rows_out = Hout * Wpp
    Lpad = _round_up(n_rows_in + (KW - 1) * dilation, SUB)   # tail for the kj shift slices

    # ---- generation-aware tiling / VMEM budget -----------------------------
    try:
        vmem_cap = int(getattr(pltpu.get_tpu_info(), "vmem_capacity_bytes", 0)) \
            or 128 * 1024 * 1024
    except Exception:
        vmem_cap = 128 * 1024 * 1024
    try:
        kind = jax.devices()[0].device_kind.lower()
    except Exception:
        kind = ""
    prefers_k128 = any(t in kind for t in ("v2", "v3", "v4", "v5"))
    vmem_budget = max(32 << 20, min((3 * vmem_cap) // 4, 96 << 20))

    pref_k = 128 if prefers_k128 else 256          # match MXU contraction width
    if Cin <= LANE:
        # TODO(synk): small-Cin branches underuse MXU lanes (K=Cin); im2col
        # packing of the KH*KW taps into the contraction would fix this.
        TC = Cin
    else:
        TC = pref_k if Cin % pref_k == 0 else LANE

    CoutP = _round_up(Cout, LANE)                  # lane-dense output
    if CoutP <= 256:
        TCout = CoutP
    elif CoutP % 256 == 0:
        TCout = 256
    else:
        TCout = LANE
    # v7x: ensure a "parallel" grid axis has >= 2 steps so both TensorCores run.
    if N * (CoutP // TCout) < 2 and TCout > LANE and CoutP // LANE >= 2:
        TCout = LANE

    def est_vmem(tc, tcout):
        x_blk = Lpad * tc * 2                      # bf16, double buffered
        w_blk = KH * KW * tc * tcout * 2
        o_blk = n_rows_out * tcout * 4
        tmp = 2 * n_rows_out * tcout * 4 + 2 * n_rows_in * tc * 2
        return 2 * x_blk + 2 * w_blk + 2 * o_blk + tmp

    while est_vmem(TC, TCout) > vmem_budget and TC > LANE:
        TC //= 2
    while est_vmem(TC, TCout) > vmem_budget and TCout > LANE:
        TCout //= 2

    CinP = _round_up(Cin, TC)

    # ---- operand prep: NCHW -> NHWC, pad, flatten spatial, bf16 cast -------
    x = jnp.transpose(x_nchw, (0, 2, 3, 1))
    x = jnp.pad(x, ((0, 0), (padding, padding),
                    (padding, padding + (Wpp - Wp)),
                    (0, CinP - Cin))).astype(jnp.bfloat16)
    x = x.reshape(N, n_rows_in, CinP)
    x = jnp.pad(x, ((0, 0), (0, Lpad - n_rows_in), (0, 0)))

    # (Cout, Cin, KH, KW) -> (KH*KW, CinP, CoutP), bf16.
    w = jnp.transpose(weight_oihw, (2, 3, 1, 0)).reshape(KH * KW, Cin, Cout)
    w = jnp.pad(w, ((0, 0), (0, CinP - Cin), (0, CoutP - Cout))).astype(jnp.bfloat16)

    # Fold eval-mode BN into per-channel scale/shift (f32), padded to CoutP.
    scale = (bn_gamma / jnp.sqrt(bn_var + eps)).astype(jnp.float32)
    shift = (bn_beta - bn_mean * scale).astype(jnp.float32)
    scale = jnp.pad(scale, (0, CoutP - Cout)).reshape(1, CoutP)
    shift = jnp.pad(shift, (0, CoutP - Cout)).reshape(1, CoutP)

    kernel = functools.partial(_aspp_kernel, n_rows_in=n_rows_in,
                               n_rows_out=n_rows_out, row_stride=Wpp,
                               KH=KH, KW=KW, dilation=dilation)

    grid = (N, CoutP // TCout, CinP // TC)

    out = pl.pallas_call(
        kernel,
        out_shape=jax.ShapeDtypeStruct((N, n_rows_out, CoutP), jnp.float32),
        grid_spec=pltpu.PrefetchScalarGridSpec(
            num_scalar_prefetch=0,
            grid=grid,
            in_specs=[
                pl.BlockSpec((None, Lpad, TC), lambda n, co, ci: (n, 0, ci)),
                pl.BlockSpec((KH * KW, TC, TCout), lambda n, co, ci: (0, ci, co)),
                pl.BlockSpec((1, TCout), lambda n, co, ci: (0, co)),
                pl.BlockSpec((1, TCout), lambda n, co, ci: (0, co)),
            ],
            out_specs=pl.BlockSpec((None, n_rows_out, TCout),
                                   lambda n, co, ci: (n, 0, co)),
        ),
        compiler_params=pltpu.CompilerParams(
            dimension_semantics=("parallel", "parallel", "arbitrary"),
            vmem_limit_bytes=int(vmem_budget),
        ),
    )(x, w, scale, shift)

    # (N, Hout*Wpp, CoutP) -> (N, Cout, Hout, Wout) to match the PyTorch module.
    out = out.reshape(N, Hout, Wpp, CoutP)[:, :, :Wout, :Cout]
    return jnp.transpose(out, (0, 3, 1, 2))


def _reference(x_nchw, weight_oihw, bn_gamma, bn_beta, bn_mean, bn_var,
               *, dilation, padding, eps=1e-5):
    """Pure-JAX reference at matching precision (bf16 operands, f32 accum)."""
    y = jax.lax.conv_general_dilated(
        x_nchw.astype(jnp.bfloat16), weight_oihw.astype(jnp.bfloat16),
        window_strides=(1, 1),
        padding=((padding, padding), (padding, padding)),
        rhs_dilation=(dilation, dilation),
        dimension_numbers=("NCHW", "OIHW", "NCHW"),
        preferred_element_type=jnp.float32)
    scale = (bn_gamma / jnp.sqrt(bn_var + eps)).reshape(1, -1, 1, 1)
    shift = (bn_beta - bn_mean * bn_gamma / jnp.sqrt(bn_var + eps)).reshape(1, -1, 1, 1)
    return jnp.maximum(y * scale + shift, 0.0)


if __name__ == "__main__":
    # Small shapes consistent with the module: ASPP branch with
    # inplanes=4, planes=8, kernel_size=3, dilation=2, padding=2.
    N, Cin, H, W = 2, 4, 16, 16
    Cout, K = 8, 3
    dilation = 2
    padding = 2

    key = jax.random.PRNGKey(0)
    kx, kw = jax.random.split(key)

    x = jax.random.normal(kx, (N, Cin, H, W), dtype=jnp.float32)

    # kaiming_normal_ (fan_in, gain=sqrt(2)) on the conv weight.
    fan_in = Cin * K * K
    std = (2.0 / fan_in) ** 0.5
    weight = jax.random.normal(kw, (Cout, Cin, K, K), dtype=jnp.float32) * std

    # BatchNorm params per _init_weight(): gamma=1, beta=0; defaults mean=0, var=1.
    bn_gamma = jnp.ones((Cout,), jnp.float32)
    bn_beta = jnp.zeros((Cout,), jnp.float32)
    bn_mean = jnp.zeros((Cout,), jnp.float32)
    bn_var = jnp.ones((Cout,), jnp.float32)

    out = aspp_module_forward(x, weight, bn_gamma, bn_beta, bn_mean, bn_var,
                              dilation=dilation, padding=padding)
    out = jax.block_until_ready(out)

    ref = _reference(x, weight, bn_gamma, bn_beta, bn_mean, bn_var,
                     dilation=dilation, padding=padding)
    assert out.shape == (N, Cout, H, W)
    assert jnp.allclose(out, ref, atol=1e-3, rtol=1e-3), "mismatch vs reference"

    print("KERNEL_OK")
</pallas_src>

<mosaic_0001>
module attributes {stable_mosaic.version = 11 : i64} {
  func.func @_aspp_kernel(%arg0: i32, %arg1: i32, %arg2: i32, %arg3: memref<1x488x4xbf16, #tpu.memory_space<vmem>>, %arg4: memref<9x4x128xbf16, #tpu.memory_space<vmem>>, %arg5: memref<1x128xf32, #tpu.memory_space<vmem>>, %arg6: memref<1x128xf32, #tpu.memory_space<vmem>>, %arg7: memref<1x384x128xf32, #tpu.memory_space<vmem>>) attributes {dimension_semantics = [#tpu.dimension_semantics<parallel>, #tpu.dimension_semantics<parallel>, #tpu.dimension_semantics<arbitrary>], iteration_bounds = array<i64: 2, 1, 1>, scalar_prefetch = 0 : i64, scratch_operands = 0 : i64, tpu.core_type = #tpu.core_type<tc>, window_params = [{transform_indices = @transform_0, window_bounds = array<i64: 1, 488, 4>}, {transform_indices = @transform_1, window_bounds = array<i64: 9, 4, 128>}, {transform_indices = @transform_2, window_bounds = array<i64: 1, 128>}, {transform_indices = @transform_3, window_bounds = array<i64: 1, 128>}, {transform_indices = @transform_4, window_bounds = array<i64: 1, 384, 128>}]} {
    %c0 = arith.constant 0 : index
    %c0_0 = arith.constant 0 : index
    %c0_1 = arith.constant 0 : index
    %0 = vector.load %arg3[%c0, %c0_0, %c0_1] : memref<1x488x4xbf16, #tpu.memory_space<vmem>>, vector<1x480x4xbf16>
    %1 = vector.shape_cast %0 : vector<1x480x4xbf16> to vector<480x4xbf16>
    %2 = vector.extract_strided_slice %1 {offsets = [0, 0], sizes = [384, 4], strides = [1, 1]} : vector<480x4xbf16> to vector<384x4xbf16>
    %c0_2 = arith.constant 0 : index
    %c0_3 = arith.constant 0 : index
    %c0_4 = arith.constant 0 : index
    %3 = vector.load %arg4[%c0_2, %c0_3, %c0_4] : memref<9x4x128xbf16, #tpu.memory_space<vmem>>, vector<1x4x128xbf16>
    %4 = vector.shape_cast %3 : vector<1x4x128xbf16> to vector<4x128xbf16>
    %cst = arith.constant dense<0.000000e+00> : vector<384x128xf32>
    %5 = tpu.matmul %2, %4, %cst {dimension_numbers = #tpu.dot_dimension_numbers<[1], [0], [0], [1], [0, 0, 1, 1], [], []>} : vector<384x4xbf16>, vector<4x128xbf16>, vector<384x128xf32> -> vector<384x128xf32>
    %6 = vector.extract_strided_slice %1 {offsets = [48, 0], sizes = [384, 4], strides = [1, 1]} : vector<480x4xbf16> to vector<384x4xbf16>
    %c3 = arith.constant 3 : index
    %c0_5 = arith.constant 0 : index
    %c0_6 = arith.constant 0 : index
    %7 = vector.load %arg4[%c3, %c0_5, %c0_6] : memref<9x4x128xbf16, #tpu.memory_space<vmem>>, vector<1x4x128xbf16>
    %8 = vector.shape_cast %7 : vector<1x4x128xbf16> to vector<4x128xbf16>
    %cst_7 = arith.constant dense<0.000000e+00> : vector<384x128xf32>
    %9 = tpu.matmul %6, %8, %cst_7 {dimension_numbers = #tpu.dot_dimension_numbers<[1], [0], [0], [1], [0, 0, 1, 1], [], []>} : vector<384x4xbf16>, vector<4x128xbf16>, vector<384x128xf32> -> vector<384x128xf32>
    %10 = arith.addf %5, %9 : vector<384x128xf32>
    %11 = vector.extract_strided_slice %1 {offsets = [96, 0], sizes = [384, 4], strides = [1, 1]} : vector<480x4xbf16> to vector<384x4xbf16>
    %c6 = arith.constant 6 : index
    %c0_8 = arith.constant 0 : index
    %c0_9 = arith.constant 0 : index
    %12 = vector.load %arg4[%c6, %c0_8, %c0_9] : memref<9x4x128xbf16, #tpu.memory_space<vmem>>, vector<1x4x128xbf16>
    %13 = vector.shape_cast %12 : vector<1x4x128xbf16> to vector<4x128xbf16>
    %cst_10 = arith.constant dense<0.000000e+00> : vector<384x128xf32>
    %14 = tpu.matmul %11, %13, %cst_10 {dimension_numbers = #tpu.dot_dimension_numbers<[1], [0], [0], [1], [0, 0, 1, 1], [], []>} : vector<384x4xbf16>, vector<4x128xbf16>, vector<384x128xf32> -> vector<384x128xf32>
    %15 = arith.addf %10, %14 : vector<384x128xf32>
    %c0_11 = arith.constant 0 : index
    %c2 = arith.constant 2 : index
    %c0_12 = arith.constant 0 : index
    %16 = vector.load %arg3[%c0_11, %c2, %c0_12] : memref<1x488x4xbf16, #tpu.memory_space<vmem>>, vector<1x480x4xbf16>
    %17 = vector.shape_cast %16 : vector<1x480x4xbf16> to vector<480x4xbf16>
    %18 = vector.extract_strided_slice %17 {offsets = [0, 0], sizes = [384, 4], strides = [1, 1]} : vector<480x4xbf16> to vector<384x4xbf16>
    %c1 = arith.constant 1 : index
    %c0_13 = arith.constant 0 : index
    %c0_14 = arith.constant 0 : index
    %19 = vector.load %arg4[%c1, %c0_13, %c0_14] : memref<9x4x128xbf16, #tpu.memory_space<vmem>>, vector<1x4x128xbf16>
    %20 = vector.shape_cast %19 : vector<1x4x128xbf16> to vector<4x128xbf16>
    %cst_15 = arith.constant dense<0.000000e+00> : vector<384x128xf32>
    %21 = tpu.matmul %18, %20, %cst_15 {dimension_numbers = #tpu.dot_dimension_numbers<[1], [0], [0], [1], [0, 0, 1, 1], [], []>} : vector<384x4xbf16>, vector<4x128xbf16>, vector<384x128xf32> -> vector<384x128xf32>
    %22 = arith.addf %15, %21 : vector<384x128xf32>
    %23 = vector.extract_strided_slice %17 {offsets = [48, 0], sizes = [384, 4], strides = [1, 1]} : vector<480x4xbf16> to vector<384x4xbf16>
    %c4 = arith.constant 4 : index
    %c0_16 = arith.constant 0 : index
    %c0_17 = arith.constant 0 : index
    %24 = vector.load %arg4[%c4, %c0_16, %c0_17] : memref<9x4x128xbf16, #tpu.memory_space<vmem>>, vector<1x4x128xbf16>
    %25 = vector.shape_cast %24 : vector<1x4x128xbf16> to vector<4x128xbf16>
    %cst_18 = arith.constant dense<0.000000e+00> : vector<384x128xf32>
    %26 = tpu.matmul %23, %25, %cst_18 {dimension_numbers = #tpu.dot_dimension_numbers<[1], [0], [0], [1], [0, 0, 1, 1], [], []>} : vector<384x4xbf16>, vector<4x128xbf16>, vector<384x128xf32> -> vector<384x128xf32>
    %27 = arith.addf %22, %26 : vector<384x128xf32>
    %28 = vector.extract_strided_slice %17 {offsets = [96, 0], sizes = [384, 4], strides = [1, 1]} : vector<480x4xbf16> to vector<384x4xbf16>
    %c7 = arith.constant 7 : index
    %c0_19 = arith.constant 0 : index
    %c0_20 = arith.constant 0 : index
    %29 = vector.load %arg4[%c7, %c0_19, %c0_20] : memref<9x4x128xbf16, #tpu.memory_space<vmem>>, vector<1x4x128xbf16>
    %30 = vector.shape_cast %29 : vector<1x4x128xbf16> to vector<4x128xbf16>
    %cst_21 = arith.constant dense<0.000000e+00> : vector<384x128xf32>
    %31 = tpu.matmul %28, %30, %cst_21 {dimension_numbers = #tpu.dot_dimension_numbers<[1], [0], [0], [1], [0, 0, 1, 1], [], []>} : vector<384x4xbf16>, vector<4x128xbf16>, vector<384x128xf32> -> vector<384x128xf32>
    %32 = arith.addf %27, %31 : vector<384x128xf32>
    %c0_22 = arith.constant 0 : index
    %c4_23 = arith.constant 4 : index
    %c0_24 = arith.constant 0 : index
    %33 = vector.load %arg3[%c0_22, %c4_23, %c0_24] : memref<1x488x4xbf16, #tpu.memory_space<vmem>>, vector<1x480x4xbf16>
    %34 = vector.shape_cast %33 : vector<1x480x4xbf16> to vector<480x4xbf16>
    %35 = vector.extract_strided_slice %34 {offsets = [0, 0], sizes = [384, 4], strides = [1, 1]} : vector<480x4xbf16> to vector<384x4xbf16>
    %c2_25 = arith.constant 2 : index
    %c0_26 = arith.constant 0 : index
    %c0_27 = arith.constant 0 : index
    %36 = vector.load %arg4[%c2_25, %c0_26, %c0_27] : memref<9x4x128xbf16, #tpu.memory_space<vmem>>, vector<1x4x128xbf16>
    %37 = vector.shape_cast %36 : vector<1x4x128xbf16> to vector<4x128xbf16>
    %cst_28 = arith.constant dense<0.000000e+00> : vector<384x128xf32>
    %38 = tpu.matmul %35, %37, %cst_28 {dimension_numbers = #tpu.dot_dimension_numbers<[1], [0], [0], [1], [0, 0, 1, 1], [], []>} : vector<384x4xbf16>, vector<4x128xbf16>, vector<384x128xf32> -> vector<384x128xf32>
    %39 = arith.addf %32, %38 : vector<384x128xf32>
    %40 = vector.extract_strided_slice %34 {offsets = [48, 0], sizes = [384, 4], strides = [1, 1]} : vector<480x4xbf16> to vector<384x4xbf16>
    %c5 = arith.constant 5 : index
    %c0_29 = arith.constant 0 : index
    %c0_30 = arith.constant 0 : index
    %41 = vector.load %arg4[%c5, %c0_29, %c0_30] : memref<9x4x128xbf16, #tpu.memory_space<vmem>>, vector<1x4x128xbf16>
    %42 = vector.shape_cast %41 : vector<1x4x128xbf16> to vector<4x128xbf16>
    %cst_31 = arith.constant dense<0.000000e+00> : vector<384x128xf32>
    %43 = tpu.matmul %40, %42, %cst_31 {dimension_numbers = #tpu.dot_dimension_numbers<[1], [0], [0], [1], [0, 0, 1, 1], [], []>} : vector<384x4xbf16>, vector<4x128xbf16>, vector<384x128xf32> -> vector<384x128xf32>
    %44 = arith.addf %39, %43 : vector<384x128xf32>
    %45 = vector.extract_strided_slice %34 {offsets = [96, 0], sizes = [384, 4], strides = [1, 1]} : vector<480x4xbf16> to vector<384x4xbf16>
    %c8 = arith.constant 8 : index
    %c0_32 = arith.constant 0 : index
    %c0_33 = arith.constant 0 : index
    %46 = vector.load %arg4[%c8, %c0_32, %c0_33] : memref<9x4x128xbf16, #tpu.memory_space<vmem>>, vector<1x4x128xbf16>
    %47 = vector.shape_cast %46 : vector<1x4x128xbf16> to vector<4x128xbf16>
    %cst_34 = arith.constant dense<0.000000e+00> : vector<384x128xf32>
    %48 = tpu.matmul %45, %47, %cst_34 {dimension_numbers = #tpu.dot_dimension_numbers<[1], [0], [0], [1], [0, 0, 1, 1], [], []>} : vector<384x4xbf16>, vector<4x128xbf16>, vector<384x128xf32> -> vector<384x128xf32>
    %49 = arith.addf %44, %48 : vector<384x128xf32>
    %c0_i32 = arith.constant 0 : i32
    %50 = arith.cmpi eq, %arg2, %c0_i32 : i32
    %51 = arith.extui %50 : i1 to i32
    %c0_i32_35 = arith.constant 0 : i32
    %52 = arith.cmpi ne, %51, %c0_i32_35 : i32
    scf.if %52 {
      %c0_40 = arith.constant 0 : index
      %c0_41 = arith.constant 0 : index
      %c0_42 = arith.constant 0 : index
      %59 = vector.load %arg7[%c0_40, %c0_41, %c0_42] : memref<1x384x128xf32, #tpu.memory_space<vmem>>, vector<1x384x128xf32>
      %60 = vector.shape_cast %59 : vector<1x384x128xf32> to vector<384x128xf32>
      %61 = vector.shape_cast %49 : vector<384x128xf32> to vector<1x384x128xf32>
      tpu.vector_store %arg7[%c0_40, %c0_41, %c0_42], %61 {strides = array<i32>} : memref<1x384x128xf32, #tpu.memory_space<vmem>>, vector<1x384x128xf32>,
    } else {
    }
    %c0_i32_36 = arith.constant 0 : i32
    %53 = arith.cmpi sgt, %arg2, %c0_i32_36 : i32
    %54 = arith.extui %53 : i1 to i32
    %c0_i32_37 = arith.constant 0 : i32
    %55 = arith.cmpi ne, %54, %c0_i32_37 : i32
    scf.if %55 {
      %c0_40 = arith.constant 0 : index
      %c0_41 = arith.constant 0 : index
      %c0_42 = arith.constant 0 : index
      %59 = vector.load %arg7[%c0_40, %c0_41, %c0_42] : memref<1x384x128xf32, #tpu.memory_space<vmem>>, vector<1x384x128xf32>
      %60 = vector.shape_cast %59 : vector<1x384x128xf32> to vector<384x128xf32>
      %61 = arith.addf %60, %49 : vector<384x128xf32>
      %c0_43 = arith.constant 0 : index
      %c0_44 = arith.constant 0 : index
      %c0_45 = arith.constant 0 : index
      %62 = vector.load %arg7[%c0_43, %c0_44, %c0_45] : memref<1x384x128xf32, #tpu.memory_space<vmem>>, vector<1x384x128xf32>
      %63 = vector.shape_cast %62 : vector<1x384x128xf32> to vector<384x128xf32>
      %64 = vector.shape_cast %61 : vector<384x128xf32> to vector<1x384x128xf32>
      tpu.vector_store %arg7[%c0_43, %c0_44, %c0_45], %64 {strides = array<i32>} : memref<1x384x128xf32, #tpu.memory_space<vmem>>, vector<1x384x128xf32>,
    } else {
    }
    %c0_i32_38 = arith.constant 0 : i32
    %56 = arith.cmpi eq, %arg2, %c0_i32_38 : i32
    %57 = arith.extui %56 : i1 to i32
    %c0_i32_39 = arith.constant 0 : i32
    %58 = arith.cmpi ne, %57, %c0_i32_39 : i32
    scf.if %58 {
      %c0_40 = arith.constant 0 : index
      %c0_41 = arith.constant 0 : index
      %c0_42 = arith.constant 0 : index
      %59 = vector.load %arg7[%c0_40, %c0_41, %c0_42] : memref<1x384x128xf32, #tpu.memory_space<vmem>>, vector<1x384x128xf32>
      %60 = vector.shape_cast %59 : vector<1x384x128xf32> to vector<384x128xf32>
      %c0_43 = arith.constant 0 : index
      %c0_44 = arith.constant 0 : index
      %61 = vector.load %arg5[%c0_43, %c0_44] : memref<1x128xf32, #tpu.memory_space<vmem>>, vector<1x128xf32>
      %62 = vector.broadcast %61 : vector<1x128xf32> to vector<384x128xf32>
      %63 = arith.mulf %60, %62 : vector<384x128xf32>
      %c0_45 = arith.constant 0 : index
      %c0_46 = arith.constant 0 : index
      %64 = vector.load %arg6[%c0_45, %c0_46] : memref<1x128xf32, #tpu.memory_space<vmem>>, vector<1x128xf32>
      %65 = vector.broadcast %64 : vector<1x128xf32> to vector<384x128xf32>
      %66 = arith.addf %63, %65 : vector<384x128xf32>
      %cst_47 = arith.constant 0.000000e+00 : f32
      %67 = vector.broadcast %cst_47 : f32 to vector<384x128xf32>
      %68 = arith.maximumf %66, %67 : vector<384x128xf32>
      %c0_48 = arith.constant 0 : index
      %c0_49 = arith.constant 0 : index
      %c0_50 = arith.constant 0 : index
      %69 = vector.load %arg7[%c0_48, %c0_49, %c0_50] : memref<1x384x128xf32, #tpu.memory_space<vmem>>, vector<1x384x128xf32>
      %70 = vector.shape_cast %69 : vector<1x384x128xf32> to vector<384x128xf32>
      %71 = vector.shape_cast %68 : vector<384x128xf32> to vector<1x384x128xf32>
      tpu.vector_store %arg7[%c0_48, %c0_49, %c0_50], %71 {strides = array<i32>} : memref<1x384x128xf32, #tpu.memory_space<vmem>>, vector<1x384x128xf32>,
    } else {
    }
    return
  }
  func.func @transform_0(%arg0: i32, %arg1: i32, %arg2: i32) -> (i32, i32, i32) {
    %c0_i32 = arith.constant 0 : i32
    %c0_i32_0 = arith.constant 0 : i32
    return %arg0, %c0_i32, %arg2 : i32, i32, i32
  }
  func.func @transform_1(%arg0: i32, %arg1: i32, %arg2: i32) -> (i32, i32, i32) {
    %c0_i32 = arith.constant 0 : i32
    %c0_i32_0 = arith.constant 0 : i32
    return %c0_i32, %arg2, %arg1 : i32, i32, i32
  }
  func.func @transform_2(%arg0: i32, %arg1: i32, %arg2: i32) -> (i32, i32) {
    %c0_i32 = arith.constant 0 : i32
    %c0_i32_0 = arith.constant 0 : i32
    return %c0_i32, %arg1 : i32, i32
  }
  func.func @transform_3(%arg0: i32, %arg1: i32, %arg2: i32) -> (i32, i32) {
    %c0_i32 = arith.constant 0 : i32
    %c0_i32_0 = arith.constant 0 : i32
    return %c0_i32, %arg1 : i32, i32
  }
  func.func @transform_4(%arg0: i32, %arg1: i32, %arg2: i32) -> (i32, i32, i32) {
    %c0_i32 = arith.constant 0 : i32
    %c0_i32_0 = arith.constant 0 : i32
    return %arg0, %c0_i32, %arg1 : i32, i32, i32
  }
}

</mosaic_0001>

<bundles_post_ra>
// kernel: tpu_custom_call.1
= control target key start
LH: loop header
LB: loop body
LE: loop exit
PB: predicated region body
PF: predicated region fallthrough
CT: control target
= control target key end

     0   :  { %9 = vsyncpa [#allocation3], 0  ;;  %s7014_s0 = inlined_call_operand.vmem [shape: bf16[2,488,4], index: 0, kind: input, shape index: {}]   ;;  %s7015_s1 = inlined_call_operand.vmem [shape: bf16[9,4,128], index: 1, kind: input, shape index: {}]   ;;  %s7016_s2 = inlined_call_operand.vmem [shape: f32[1,128], index: 2, kind: input, shape index: {}]   ;;  %s7017_s3 = inlined_call_operand.vmem [shape: f32[1,128], index: 3, kind: input, shape index: {}]   ;;  %s7018_s4 = inlined_call_operand.hbm [shape: f32[2,384,128], index: 4, kind: output, shape index: {}]  }
   0x1   :  { %11 = vsyncpa [#allocation3 + $0x1], 0  ;;  %s5357_s15 = smov 0   ;;  %s5359_s16 = smov 0  }
   0x2   :  { %s5361_s17 = smov 0   ;;  %s5363_s18 = smov 0  }
   0x3   :  { %s5365_s19 = smov 0   ;;  %s5367_s20 = smov 0  }
   0x4 LB: > { %s4135_s21 = sadd.s32 4294967295, %s5327_s20   ;;  %s4136_s22 = sadd.s32 4294967294, %s5327_s20   ;;  %s5327_s20 = sphi %s5367_s20, %s17_s20   ;;  %s5323_s19 = sphi %s5365_s19, %s7199_s19   ;;  %s5319_s18 = sphi %s5363_s18, %s7198_s18   ;;  %s5315_s17 = sphi %s5361_s17, %s7197_s17   ;;  %s5311_s16 = sphi %s5359_s16, %s7196_s16   ;;  %s5307_s15 = sphi %s5357_s15, %s7195_s15  }
   0x5   : > { %s36_s23 = sadd.s32 1, %s5323_s19  ;;  %s153_s24 = sadd.s32 1, %s5315_s17 }
   0x6   : > { %p38_p0 = scmp.ge.s32.totalorder %s36_s23, 2  ;;  %p163_p1 = scmp.ne.s32.totalorder %s5315_s17, %s5311_s16 }
   0x7   : > { %p164_p2 = scmp.eq.s32.totalorder %s4135_s21, 1  ;;  %p169_p3 = scmp.ne.s32.totalorder %s5311_s16, %s5307_s15 }
   0x8   : > { %s7201_s23 = smov (%p38_p0, %s36_s23), 0  ;;  %p170_p5 = scmp.eq.s32.totalorder %s4136_s22, 1 }
   0x9   : > { %p5397_p4 = por %p164_p2, %p163_p1  ;;  %s148_s26 = ssub.s32 %s5323_s19, %s7201_s23 }
   0xa   : > { %p4142_p6 = scmp.ge.s32.totalorder %s5327_s20, 1  ;;  %p151_p7 = scmp.eq.s32.totalorder %s148_s26, 0 }
   0xb   : > { %p5404_p8 = por %p170_p5, %p169_p3  ;;  %p221_p9 = scmp.lt.s32.totalorder %s5327_s20, 3 }
   0xc   : > { %s5410_s28 = scalar_select %p151_p7, %s5315_s17, %s153_s24  }
   0xd   : > { %p222_p10 = pnand %p4142_p6, %p221_p9 }
   0xf   : > { %225 = sbr.rel (%p222_p10) target bundleno = 677 (0x2a5), region = 36 }
  0x14   : > { %v4144_v0 = vld [vmem:[%s7015_s1 + $0x6] sm:$0x3]  ;;  %vm541_vm0 = vcmask 1041408   ;;  %p263_p11 = scmp.lt.s32.totalorder %s5319_s18, 1  ;;  %v345_v2 = vld [vmem:[%s7015_s1] sm:$0x3] }
  0x15   : > { %5116 = vmatprep.subr.msk.bf16.mxu1 %vm541_vm0, %v4144_v0  ;;  %5115 = vmatprep.subr.msk.bf16.mxu0 %vm541_vm0, %v4144_v0  ;;  %v543_v1 = vsel %vm541_vm0, %v4144_v0, 0  ;;  %v4220_v3 = vld [vmem:[%s7015_s1 + $0xc] sm:$0x3]  ;;  %vm468_vm1 = vcmask 31744   ;;  %v4248_v8 = vld [vmem:[%s7015_s1 + $0x2] sm:$0x3] }
  0x16   : > { %5114 = vmatpush3.bf16.msra.mxu1 %v543_v1  ;;  %4664 = vmatpush3.bf16.msra.mxu0 %v543_v1  ;;  %s264_s9 = scalar_select %p263_p11, %s5319_s18, 1  ;;  %v1049_v7 = vsel %vm541_vm0, %v4220_v3, 0  ;;  %v795_v10 = vsel %vm541_vm0, %v345_v2, 0  ;;  %v4298_v11 = vld [vmem:[%s7015_s1 + $0x8] sm:$0x3]  ;;  %v1633_v33 = vsel %vm541_vm0, %v4248_v8, 0 }
  0x17   : > { %5117 = vmatprep.subr.msk.bf16.mxu1 %vm541_vm0, %v345_v2  ;;  %5118 = vmatprep.subr.msk.bf16.mxu0 %vm541_vm0, %v4220_v3  ;;  %v1947_v35 = vsel %vm541_vm0, %v4298_v11, 0  ;;  %v5537_v37 = vld [vmem:[%s7015_s1 + $0xe] sm:$0x3]  ;;  %v5542_v38 = vld [vmem:[%s7015_s1 + $0x4] sm:$0x3]  ;;  %vm1510_vm2 = vcmask 1046528  }
  0x18   : > { %s5126_s10 = smul.u32 244, %s264_s9  ;;  %v2666_v63 = vsel %vm541_vm0, %v5542_v38, 0  ;;  %v2261_v1 = vsel %vm541_vm0, %v5537_v37, 0  ;;  %vm2543_vm3 = vcmask 1045504   ;;  %s5329_s7 = smov [#allocation2]  }
  0x19   : > { %s5127_s24 = smul.u32 6144, %s5319_s18  ;;  %s5255_s8 = sshll.u32 %s5329_s7, 4  ;;  %s5256_s8 = int_to_ptr.vmem [resolvable:$false] %s5255_s8 }
  0x1a   : > { %s5431_s13 = scalar_lea.vmem %s7014_s0, %s5126_s10  ;;  %s260_s10 = sand.u32 1, %s5311_s16  }
  0x1b   : > { %v5434_v4 = vld [vmem:[%s5431_s13 + $0x18] sm:$0xff]   ;;  %v5442_v6 = vld [vmem:[%s5431_s13 + $0x20] sm:$0xff]   ;;  %v5460_v12 = vld [vmem:[%s5431_s13 + $0x28] sm:$0xff]   ;;  %s6961_s5 = scalar_lea.hbm %s7018_s4, %s5127_s24  ;;  %s6969_s18 = scalar_lea.sflag [#allocation3], %s260_s10 }
  0x1c   : > { %v5437_v5 = vld [vmem:[%s5431_s13 + $0x78] sm:$0xff]   ;;  %4665 = vmatprep.mubr.msk.bf16.mxu0 %vm468_vm1, %v5434_v4  ;;  %v5451_v9 = vld [vmem:[%s5431_s13 + $0x80] sm:$0xff]   ;;  %v5465_v13 = vld [vmem:[%s5431_s13 + $0x88] sm:$0xff]   ;;  %s5257_s9 = scalar_lea.vmem %s5256_s8, 12288 }
  0x1d   : > { %4689 = vmatprep.mubr.msk.bf16.mxu1 %vm468_vm1, %v5437_v5  ;;  %4666 = vmatmul.mubr.msk.bf16.vlgmr.msra.gmra.mxu0 %vm468_vm1, %v5442_v6  ;;  %v5191_v14 = vld [vmem:[%s5431_s13 + $0x30] sm:$0xff]   ;;  %v5193_v16 = vld [vmem:[%s5431_s13 + $0x38] sm:$0xff]   ;;  %v5195_v18 = vld [vmem:[%s5431_s13 + $0x40] sm:$0xff]  }
  0x1e   : > { %4690 = vmatmul.mubr.msk.bf16.vlgmr.msra.gmra.mxu1 %vm468_vm1, %v5451_v9  ;;  %4764 = vmatpush3.bf16.msra.mxu0 %v1049_v7  ;;  %v5474_v15 = vld [vmem:[%s5431_s13 + $0x90] sm:$0xff]   ;;  %v5479_v17 = vld [vmem:[%s5431_s13 + $0x98] sm:$0xff]   ;;  %v5489_v19 = vld [vmem:[%s5431_s13 + $0xa0] sm:$0xff]  }
  0x1f   : > { %4714 = vmatpush3.bf16.msra.mxu1 %v795_v10  ;;  %4669 = vmatprep.mubr.msk.bf16.mxu0 %vm468_vm1, %v5460_v12  ;;  %v5197_v20 = vld [vmem:[%s5431_s13 + $0x48] sm:$0xff]   ;;  %v5199_v22 = vld [vmem:[%s5431_s13 + $0x50] sm:$0xff]   ;;  %v5201_v24 = vld [vmem:[%s5431_s13 + $0x58] sm:$0xff]  }
  0x20   : > { %4693 = vmatprep.mubr.msk.bf16.mxu1 %vm468_vm1, %v5465_v13  ;;  %5119 = vmatprep.subr.msk.bf16.mxu1 %vm541_vm0, %v4248_v8  ;;  %v5493_v21 = vld [vmem:[%s5431_s13 + $0xa8] sm:$0xff]   ;;  %v5503_v23 = vld [vmem:[%s5431_s13 + $0xb0] sm:$0xff]   ;;  %v5507_v25 = vld [vmem:[%s5431_s13 + $0xb8] sm:$0xff]  }
  0x21   : > { %5120 = vmatprep.subr.msk.bf16.mxu0 %vm541_vm0, %v4298_v11  ;;  %v5203_v26 = vld [vmem:[%s5431_s13 + $0x60] sm:$0xff]   ;;  %v5205_v28 = vld [vmem:[%s5431_s13 + $0x68] sm:$0xff]   ;;  %v5207_v30 = vld [vmem:[%s5431_s13 + $0x70] sm:$0xff]  }
  0x22   : > { %v5204_v27 = vld [vmem:[%s5431_s13 + $0xc0] sm:$0xff]   ;;  %v5206_v29 = vld [vmem:[%s5431_s13 + $0xc8] sm:$0xff]   ;;  %v5208_v31 = vld [vmem:[%s5431_s13 + $0xd0] sm:$0xff]  }
  0x23   : > { %v5209_v32 = vld [vmem:[%s5431_s13] sm:$0xff]   ;;  %v5210_v34 = vld [vmem:[%s5431_s13 + $0x8] sm:$0xff]   ;;  %v5211_v36 = vld [vmem:[%s5431_s13 + $0x10] sm:$0xff]  }
  0x24   : > { %v5212_v39 = vld [vmem:[%s5431_s13 + $0xd8] sm:$0xff]   ;;  %v1324_v40 = vld [vmem:[%s5431_s13] sm:$0xe]  ;;  %v5609_v41 = vld [vmem:[%s5431_s13 + $0x4] sm:$0xf] }
  0x25   : > { %4670 = vmatmul.mubr.msk.bf16.gmra.mxu0 %vm468_vm1, %v5191_v14  ;;  %v5213_v42 = vld [vmem:[%s5431_s13 + $0xe0] sm:$0xff]   ;;  %v5613_v43 = vld [vmem:[%s5431_s13 + $0x18] sm:$0xff]   ;;  %v4249_v45 = vcombine.low %v1324_v40, %v5609_v41  ;;  %v5620_v46 = vld [vmem:[%s5431_s13 + $0x8] sm:$0xff]  }
  0x26   : > { %4694 = vmatmul.mubr.msk.bf16.gmra.mxu1 %vm468_vm1, %v5474_v15  ;;  %4673 = vmatprep.mubr.msk.bf16.mxu0 %vm468_vm1, %v5193_v16  ;;  %v5616_v44 = vld [vmem:[%s5431_s13 + $0x20] sm:$0xff]   ;;  %v1516_v47 = vrot.slane %v5613_v43, 1  ;;  %v1512_v50 = vrot.slane %v5620_v46, 1  ;;  %v5214_v51 = vld [vmem:[%s5431_s13 + $0xe8] sm:$0xff]   ;;  %v5637_v54 = vld [vmem:[%s5431_s13 + $0x10] sm:$0xff]  }
  0x27   : > { %4697 = vmatprep.mubr.msk.bf16.mxu1 %vm468_vm1, %v5479_v17  ;;  %v1518_v48 = vrot.slane %v5616_v44, 1  ;;  %v1511_v49 = vrot.slane %v4249_v45, 1  ;;  %v5633_v52 = vld [vmem:[%s5431_s13 + $0x28] sm:$0xff]   ;;  %v5642_v56 = vld [vmem:[%s5431_s13 + $0x30] sm:$0xff]   ;;  %v1514_v58 = vrot.slane %v5637_v54, 1  ;;  %v5653_v61 = vld [vmem:[%s5431_s13 + $0x38] sm:$0xff]  }
  0x28   : > { %v1520_v57 = vrot.slane %v5633_v52, 1  ;;  %v1522_v59 = vrot.slane %v5642_v56, 1  ;;  %v5659_v0 = vld [vmem:[%s5431_s13 + $0x40] sm:$0xff]   ;;  %v5695_v11 = vld [vmem:[%s5431_s13 + $0x50] sm:$0xff]  }
  0x29   : > { %v1519_v53 = vsel %vm1510_vm2, %v1516_v47, %v1518_v48  ;;  %v1513_v55 = vsel %vm1510_vm2, %v1511_v49, %v1512_v50  ;;  %v1515_v62 = vsel %vm1510_vm2, %v1512_v50, %v1514_v58  ;;  %v1517_v2 = vsel %vm1510_vm2, %v1514_v58, %v1516_v47  ;;  %v5830_v58 = vld [vmem:[%s5431_s13 + $0xa8] sm:$0xff]  }
  0x2a   : > { %v1521_v60 = vsel %vm1510_vm2, %v1518_v48, %v1520_v57  ;;  %v1523_v3 = vsel %vm1510_vm2, %v1520_v57, %v1522_v59  ;;  %v1526_v7 = vrot.slane %v5659_v0, 1  ;;  %7057 = vst [vmem:[#allocation13_spill] sm:$0xff] %v5830_v58 }
  0x2d   : > { %4674 = vmatmul.mubr.msk.bf16.gmra.mxu0 %vm468_vm1, %v5195_v18 }
  0x2e   : > { %4698 = vmatmul.mubr.msk.bf16.gmra.mxu1 %vm468_vm1, %v5489_v19  ;;  %4677 = vmatprep.mubr.msk.bf16.mxu0 %vm468_vm1, %v5197_v20 }
  0x2f   : > { %4701 = vmatprep.mubr.msk.bf16.mxu1 %vm468_vm1, %v5493_v21 }
  0x35   : > { %4678 = vmatmul.mubr.msk.bf16.gmra.mxu0 %vm468_vm1, %v5199_v22 }
  0x36   : > { %4702 = vmatmul.mubr.msk.bf16.gmra.mxu1 %vm468_vm1, %v5503_v23  ;;  %4681 = vmatprep.mubr.msk.bf16.mxu0 %vm468_vm1, %v5201_v24 }
  0x37   : > { %4705 = vmatprep.mubr.msk.bf16.mxu1 %vm468_vm1, %v5507_v25 }
  0x3d   : > { %4682 = vmatmul.mubr.msk.bf16.gmra.mxu0 %vm468_vm1, %v5203_v26 }
  0x3e   : > { %4706 = vmatmul.mubr.msk.bf16.gmra.mxu1 %vm468_vm1, %v5204_v27  ;;  %4685 = vmatprep.mubr.msk.bf16.mxu0 %vm468_vm1, %v5205_v28 }
  0x3f   : > { %4709 = vmatprep.mubr.msk.bf16.mxu1 %vm468_vm1, %v5206_v29 }
  0x45   : > { %4686 = vmatmul.mubr.msk.bf16.gmra.mxu0 %vm468_vm1, %v5207_v30 }
  0x46   : > { %4710 = vmatmul.mubr.msk.bf16.gmra.mxu1 %vm468_vm1, %v5208_v31  ;;  %4765 = vmatprep.mubr.msk.bf16.mxu0 %vm468_vm1, %v5191_v14 }
  0x47   : > { %4715 = vmatprep.mubr.msk.bf16.mxu1 %vm468_vm1, %v5209_v32 }
  0x4d   : > { %4766 = vmatmul.mubr.msk.bf16.vlgmr.msra.gmra.mxu0 %vm468_vm1, %v5193_v16 }
  0x4e   : > { %4716 = vmatmul.mubr.msk.bf16.vlgmr.msra.gmra.mxu1 %vm468_vm1, %v5210_v34  ;;  %4864 = vmatpush3.bf16.msra.mxu0 %v1947_v35  ;;  %v5780_v35 = vld [vmem:[%s5431_s13 + $0x90] sm:$0xff]  }
  0x4f   : > { %4814 = vmatpush3.bf16.msra.mxu1 %v1633_v33  ;;  %4719 = vmatprep.mubr.msk.bf16.mxu1 %vm468_vm1, %v5211_v36  ;;  %v5774_v33 = vld [vmem:[%s5431_s13 + $0x88] sm:$0xff]   ;;  %7051 = vst [vmem:[#allocation7_spill] sm:$0xff] %v5780_v35 }
  0x50   : > { %4769 = vmatprep.mubr.msk.bf16.mxu0 %vm468_vm1, %v5195_v18  ;;  %5121 = vmatprep.subr.msk.bf16.mxu1 %vm541_vm0, %v5537_v37  ;;  %7050 = vst [vmem:[#allocation6_spill] sm:$0xff] %v5774_v33  ;;  %v1544_v36 = vrot.slane %v5774_v33, 1  ;;  %v1546_v37 = vrot.slane %v5780_v35, 1 }
  0x51   : > { %5122 = vmatprep.subr.msk.bf16.mxu0 %vm541_vm0, %v5542_v38 }
  0x52   : > { %v5799_v40 = vsel %vm1510_vm2, %v1544_v36, %v1546_v37 }
  0x55   : > { %4770 = vmatmul.mubr.msk.bf16.gmra.mxu0 %vm468_vm1, %v5197_v20 }
  0x56   : > { %4720 = vmatmul.mubr.msk.bf16.gmra.mxu1 %vm468_vm1, %v5434_v4  ;;  %4773 = vmatprep.mubr.msk.bf16.mxu0 %vm468_vm1, %v5199_v22  ;;  %v5669_v4 = vld [vmem:[%s7015_s1 + $0xa] sm:$0x3] }
  0x57   : > { %4723 = vmatprep.mubr.msk.bf16.mxu1 %vm468_vm1, %v5442_v6  ;;  %v5676_v6 = vld [vmem:[%s7015_s1 + $0x10] sm:$0x3] }
  0x5d   : > { %4774 = vmatmul.mubr.msk.bf16.gmra.mxu0 %vm468_vm1, %v5201_v24 }
  0x5e   : > { %4724 = vmatmul.mubr.msk.bf16.gmra.mxu1 %vm468_vm1, %v5460_v12  ;;  %4777 = vmatprep.mubr.msk.bf16.mxu0 %vm468_vm1, %v5203_v26 }
  0x5f   : > { %4727 = vmatprep.mubr.msk.bf16.mxu1 %vm468_vm1, %v5191_v14 }
  0x65   : > { %4778 = vmatmul.mubr.msk.bf16.gmra.mxu0 %vm468_vm1, %v5205_v28 }
  0x66   : > { %4728 = vmatmul.mubr.msk.bf16.gmra.mxu1 %vm468_vm1, %v5193_v16  ;;  %4781 = vmatprep.mubr.msk.bf16.mxu0 %vm468_vm1, %v5207_v30 }
  0x67   : > { %4731 = vmatprep.mubr.msk.bf16.mxu1 %vm468_vm1, %v5195_v18 }
  0x6d   : > { %4782 = vmatmul.mubr.msk.bf16.gmra.mxu0 %vm468_vm1, %v5437_v5 }
  0x6e   : > { %4732 = vmatmul.mubr.msk.bf16.gmra.mxu1 %vm468_vm1, %v5197_v20  ;;  %4785 = vmatprep.mubr.msk.bf16.mxu0 %vm468_vm1, %v5451_v9 }
  0x6f   : > { %4735 = vmatprep.mubr.msk.bf16.mxu1 %vm468_vm1, %v5199_v22 }
  0x75   : > { %4786 = vmatmul.mubr.msk.bf16.gmra.mxu0 %vm468_vm1, %v5465_v13 }
  0x76   : > { %4736 = vmatmul.mubr.msk.bf16.gmra.mxu1 %vm468_vm1, %v5201_v24  ;;  %4789 = vmatprep.mubr.msk.bf16.mxu0 %vm468_vm1, %v5474_v15 }
  0x77   : > { %4739 = vmatprep.mubr.msk.bf16.mxu1 %vm468_vm1, %v5203_v26 }
  0x7d   : > { %4790 = vmatmul.mubr.msk.bf16.gmra.mxu0 %vm468_vm1, %v5479_v17 }
  0x7e   : > { %4740 = vmatmul.mubr.msk.bf16.gmra.mxu1 %vm468_vm1, %v5205_v28  ;;  %4793 = vmatprep.mubr.msk.bf16.mxu0 %vm468_vm1, %v5489_v19 }
  0x7f   : > { %4743 = vmatprep.mubr.msk.bf16.mxu1 %vm468_vm1, %v5207_v30 }
  0x85   : > { %4794 = vmatmul.mubr.msk.bf16.gmra.mxu0 %vm468_vm1, %v5493_v21 }
  0x86   : > { %4744 = vmatmul.mubr.msk.bf16.gmra.mxu1 %vm468_vm1, %v5437_v5  ;;  %4797 = vmatprep.mubr.msk.bf16.mxu0 %vm468_vm1, %v5503_v23  ;;  %v1524_v5 = vrot.slane %v5653_v61, 1 }
  0x87   : > { %4747 = vmatprep.mubr.msk.bf16.mxu1 %vm468_vm1, %v5451_v9  ;;  %v5689_v9 = vld [vmem:[%s5431_s13 + $0x48] sm:$0xff]  }
  0x88   : > { %v5686_v8 = vsel %vm1510_vm2, %v1522_v59, %v1524_v5  ;;  %v5692_v10 = vsel %vm1510_vm2, %v1524_v5, %v1526_v7  ;;  %v1528_v12 = vrot.slane %v5689_v9, 1 }
  0x8a   : > { %v5706_v14 = vsel %vm1510_vm2, %v1526_v7, %v1528_v12 }
  0x8d   : > { %4798 = vmatmul.mubr.msk.bf16.gmra.mxu0 %vm468_vm1, %v5507_v25 }
  0x8e   : > { %4748 = vmatmul.mubr.msk.bf16.gmra.mxu1 %vm468_vm1, %v5465_v13  ;;  %4801 = vmatprep.mubr.msk.bf16.mxu0 %vm468_vm1, %v5204_v27  ;;  %v1530_v13 = vrot.slane %v5695_v11, 1  ;;  %v5752_v27 = vld [vmem:[%s5431_s13 + $0x78] sm:$0xff]  }
  0x8f   : > { %4751 = vmatprep.mubr.msk.bf16.mxu1 %vm468_vm1, %v5474_v15  ;;  %v5709_v15 = vld [vmem:[%s5431_s13 + $0x58] sm:$0xff]   ;;  %v1540_v30 = vrot.slane %v5752_v27, 1 }
  0x90   : > { %v5712_v16 = vsel %vm1510_vm2, %v1528_v12, %v1530_v13  ;;  %v1532_v18 = vrot.slane %v5709_v15, 1 }
  0x92   : > { %v5727_v20 = vsel %vm1510_vm2, %v1530_v13, %v1532_v18  ;;  %v1372_v13 = vld [vmem:[%s5431_s13 + $0xc0] sm:$0xf] }
  0x95   : > { %4802 = vmatmul.mubr.msk.bf16.gmra.mxu0 %vm468_vm1, %v5206_v29  ;;  %v5758_v29 = vld [vmem:[%s5431_s13 + $0x80] sm:$0xff]  }
  0x96   : > { %4752 = vmatmul.mubr.msk.bf16.gmra.mxu1 %vm468_vm1, %v5479_v17  ;;  %4805 = vmatprep.mubr.msk.bf16.mxu0 %vm468_vm1, %v5208_v31  ;;  %v5715_v17 = vld [vmem:[%s5431_s13 + $0x60] sm:$0xff]   ;;  %7049 = vst [vmem:[#allocation5_spill] sm:$0xff] %v5758_v29  ;;  %v1542_v31 = vrot.slane %v5758_v29, 1 }
  0x97   : > { %4755 = vmatprep.mubr.msk.bf16.mxu1 %vm468_vm1, %v5489_v19  ;;  %v1534_v19 = vrot.slane %v5715_v17, 1 }
  0x98   : > { %v5777_v34 = vsel %vm1510_vm2, %v1540_v30, %v1542_v31  ;;  %v5793_v38 = vsel %vm1510_vm2, %v1542_v31, %v1544_v36 }
  0x99   : > { %v5733_v22 = vsel %vm1510_vm2, %v1532_v18, %v1534_v19  ;;  %v1373_v18 = vld [vmem:[%s5431_s13 + $0xc4] sm:$0xf] }
  0x9d   : > { %4806 = vmatmul.mubr.msk.bf16.gmra.mxu0 %vm468_vm1, %v5212_v39  ;;  %v5796_v39 = vld [vmem:[%s5431_s13 + $0x98] sm:$0xff]  }
  0x9e   : > { %4756 = vmatmul.mubr.msk.bf16.gmra.mxu1 %vm468_vm1, %v5493_v21  ;;  %4809 = vmatprep.mubr.msk.bf16.mxu0 %vm468_vm1, %v5213_v42  ;;  %v5730_v21 = vld [vmem:[%s5431_s13 + $0x68] sm:$0xff]   ;;  %7052 = vst [vmem:[#allocation8_spill] sm:$0xff] %v5796_v39  ;;  %v5802_v42 = vld [vmem:[%s5431_s13 + $0xa0] sm:$0xff]   ;;  %v1548_v48 = vrot.slane %v5796_v39, 1 }
  0x9f   : > { %4759 = vmatprep.mubr.msk.bf16.mxu1 %vm468_vm1, %v5503_v23  ;;  %v5736_v23 = vld [vmem:[%s5431_s13 + $0x70] sm:$0xff]   ;;  %v1536_v24 = vrot.slane %v5730_v21, 1  ;;  %7053 = vst [vmem:[#allocation9_spill] sm:$0xff] %v5802_v42  ;;  %v1550_v50 = vrot.slane %v5802_v42, 1 }
  0xa0   : > { %v5827_v57 = vsel %vm1510_vm2, %v1546_v37, %v1548_v48  ;;  %v5877_v37 = vcombine.low %v1372_v13, %v1373_v18 }
  0xa1   : > { %v5749_v26 = vsel %vm1510_vm2, %v1534_v19, %v1536_v24 }
  0xa2   : > { %7066 = vst [vmem:[#allocation22_spill] sm:$0xff] %v5877_v37 }
  0xa5   : > { %4810 = vmatmul.mubr.msk.bf16.gmra.mxu0 %vm468_vm1, %v5214_v51 }
  0xa6   : > { %4760 = vmatmul.mubr.msk.bf16.gmra.mxu1 %vm468_vm1, %v5507_v25  ;;  %4865 = vmatprep.mubr.msk.bf16.mxu0 %vm468_vm1, %v1519_v53  ;;  %v1538_v25 = vrot.slane %v5736_v23, 1 }
  0xa7   : > { %4815 = vmatprep.mubr.msk.bf16.mxu1 %vm468_vm1, %v1513_v55 }
  0xa8   : > { %v5755_v28 = vsel %vm1510_vm2, %v1536_v24, %v1538_v25  ;;  %v5771_v32 = vsel %vm1510_vm2, %v1538_v25, %v1540_v30  ;;  %v5870_v30 = vld [vmem:[%s5431_s13 + $0xb8] sm:$0xff]  }
  0xa9   : > { %7064 = vst [vmem:[#allocation20_spill] sm:$0xff] %v5870_v30 }
  0xad   : > { %4866 = vmatmul.mubr.msk.bf16.vlgmr.msra.gmra.mxu0 %vm468_vm1, %v1521_v60 }
  0xae   : > { %4816 = vmatmul.mubr.msk.bf16.vlgmr.msra.gmra.mxu1 %vm468_vm1, %v1515_v62  ;;  %4964 = vmatpush3.bf16.msra.mxu0 %v2666_v63  ;;  %v5838_v62 = vld [vmem:[%s5431_s13 + $0xb0] sm:$0xff]  }
  0xaf   : > { %4914 = vmatpush3.bf16.msra.mxu1 %v2261_v1  ;;  %4819 = vmatprep.mubr.msk.bf16.mxu1 %vm468_vm1, %v1517_v2  ;;  %7058 = vst [vmem:[#allocation14_spill] sm:$0xff] %v5838_v62  ;;  %v1554_v7 = vrot.slane %v5838_v62, 1 }
  0xb0   : > { %4869 = vmatprep.mubr.msk.bf16.mxu0 %vm468_vm1, %v1523_v3  ;;  %5123 = vmatprep.subr.msk.bf16.mxu1 %vm541_vm0, %v5669_v4 }
  0xb1   : > { %5124 = vmatprep.subr.msk.bf16.mxu0 %vm541_vm0, %v5676_v6 }
  0xb5   : > { %4870 = vmatmul.mubr.msk.bf16.gmra.mxu0 %vm468_vm1, %v5686_v8 }
  0xb6   : > { %4820 = vmatmul.mubr.msk.bf16.gmra.mxu1 %vm468_vm1, %v1519_v53  ;;  %4873 = vmatprep.mubr.msk.bf16.mxu0 %vm468_vm1, %v5692_v10 }
  0xb7   : > { %4823 = vmatprep.mubr.msk.bf16.mxu1 %vm468_vm1, %v1521_v60  ;;  %v5835_v60 = vsel %vm1510_vm2, %v1548_v48, %v1550_v50 }
  0xbd   : > { %4874 = vmatmul.mubr.msk.bf16.gmra.mxu0 %vm468_vm1, %v5706_v14 }
  0xbe   : > { %4824 = vmatmul.mubr.msk.bf16.gmra.mxu1 %vm468_vm1, %v1523_v3  ;;  %4877 = vmatprep.mubr.msk.bf16.mxu0 %vm468_vm1, %v5712_v16  ;;  %v1552_v3 = vrot.slane %v5830_v58, 1  ;;  %v1926_v58 = vrot.slane %v5877_v37, 1 }
  0xbf   : > { %4827 = vmatprep.mubr.msk.bf16.mxu1 %vm468_vm1, %v5686_v8 }
  0xc0   : > { %v5867_v25 = vsel %vm1510_vm2, %v1550_v50, %v1552_v3  ;;  %v5875_v36 = vsel %vm1510_vm2, %v1552_v3, %v1554_v7  ;;  %v1556_v3 = vrot.slane %v5870_v30, 1 }
  0xc1   : > { %7063 = vst [vmem:[#allocation19_spill] sm:$0xff] %v5867_v25  ;;  %7065 = vst [vmem:[#allocation21_spill] sm:$0xff] %v5875_v36 }
  0xc2   : > { %v5912_v39 = vsel %vm1510_vm2, %v1556_v3, %v1926_v58 }
  0xc3   : > { %7073 = vst [vmem:[#allocation29_spill] sm:$0xff] %v5912_v39 }
  0xc5   : > { %4878 = vmatmul.mubr.msk.bf16.gmra.mxu0 %vm468_vm1, %v5727_v20 }
  0xc6   : > { %4828 = vmatmul.mubr.msk.bf16.gmra.mxu1 %vm468_vm1, %v5692_v10  ;;  %4881 = vmatprep.mubr.msk.bf16.mxu0 %vm468_vm1, %v5733_v22 }
  0xc7   : > { %4831 = vmatprep.mubr.msk.bf16.mxu1 %vm468_vm1, %v5706_v14 }
  0xcd   : > { %4882 = vmatmul.mubr.msk.bf16.gmra.mxu0 %vm468_vm1, %v5749_v26 }
  0xce   : > { %4832 = vmatmul.mubr.msk.bf16.gmra.mxu1 %vm468_vm1, %v5712_v16  ;;  %4885 = vmatprep.mubr.msk.bf16.mxu0 %vm468_vm1, %v5755_v28 }
  0xcf   : > { %4835 = vmatprep.mubr.msk.bf16.mxu1 %vm468_vm1, %v5727_v20 }
  0xd5   : > { %4886 = vmatmul.mubr.msk.bf16.gmra.mxu0 %vm468_vm1, %v5771_v32 }
  0xd6   : > { %4836 = vmatmul.mubr.msk.bf16.gmra.mxu1 %vm468_vm1, %v5733_v22  ;;  %4889 = vmatprep.mubr.msk.bf16.mxu0 %vm468_vm1, %v5777_v34 }
  0xd7   : > { %4839 = vmatprep.mubr.msk.bf16.mxu1 %vm468_vm1, %v5749_v26 }
  0xdd   : > { %v5804_v45 = vpop.f32.mrf.mxu0  ;;  %4890 = vmatmul.mubr.msk.bf16.gmra.mxu0 %vm468_vm1, %v5793_v38 }
  0xde   : > { %v5808_v47 = vpop.f32.mrf.mxu1  ;;  %4840 = vmatmul.mubr.msk.bf16.gmra.mxu1 %vm468_vm1, %v5755_v28  ;;  %4893 = vmatprep.mubr.msk.bf16.mxu0 %vm468_vm1, %v5799_v40 }
  0xdf   : > { %7054 = vst [vmem:[#allocation10_spill] sm:$0xff] %v5808_v47  ;;  %v5815_v49 = vpop.f32.mrf.mxu0  ;;  %4843 = vmatprep.mubr.msk.bf16.mxu1 %vm468_vm1, %v5771_v32 }
  0xe0   : > { %v5820_v51 = vpop.f32.mrf.mxu1 }
  0xe1   : > { %7055 = vst [vmem:[#allocation11_spill] sm:$0xff] %v5820_v51  ;;  %v5822_v53 = vpop.f32.mrf.mxu0 }
  0xe2   : > { %v5824_v55 = vpop.f32.mrf.mxu1 }
  0xe3   : > { %7056 = vst [vmem:[#allocation12_spill] sm:$0xff] %v5824_v55  ;;  %v5832_v59 = vpop.f32.mrf.mxu0 }
  0xe4   : > { %v5840_v63 = vpop.f32.mrf.mxu1 }
  0xe5   : > { %7059 = vst [vmem:[#allocation15_spill] sm:$0xff] %v5840_v63  ;;  %v5842_v1 = vpop.f32.mrf.mxu0  ;;  %4894 = vmatmul.mubr.msk.bf16.gmra.mxu0 %vm468_vm1, %v5827_v57  ;;  %v5935_v63 = vld [vmem:[%s5431_s13 + $0xd8] sm:$0xf] }
  0xe6   : > { %v5846_v2 = vpop.f32.mrf.mxu1  ;;  %4844 = vmatmul.mubr.msk.bf16.gmra.mxu1 %vm468_vm1, %v5777_v34  ;;  %4897 = vmatprep.mubr.msk.bf16.mxu0 %vm468_vm1, %v5835_v60  ;;  %7076 = vst [vmem:[#allocation32_spill] sm:$0xff] %v5935_v63 }
  0xe7   : > { %7060 = vst [vmem:[#allocation16_spill] sm:$0xff] %v5846_v2  ;;  %v5853_v5 = vpop.f32.mrf.mxu0  ;;  %4847 = vmatprep.mubr.msk.bf16.mxu1 %vm468_vm1, %v5793_v38  ;;  %v5242_v2 = vld [vmem:[%s5431_s13 + $0xd0] sm:$0xff]  }
  0xe8   : > { %v5858_v12 = vpop.f32.mrf.mxu1 }
  0xe9   : > { %7061 = vst [vmem:[#allocation17_spill] sm:$0xff] %v5858_v12  ;;  %v5862_v19 = vpop.f32.mrf.mxu0  ;;  %v5907_v12 = vld [vmem:[%s5431_s13 + $0xc8] sm:$0xff]  }
  0xea   : > { %v5864_v24 = vpop.f32.mrf.mxu1  ;;  %7072 = vst [vmem:[#allocation28_spill] sm:$0xff] %v5907_v12 }
  0xeb   : > { %7062 = vst [vmem:[#allocation18_spill] sm:$0xff] %v5864_v24  ;;  %v5872_v31 = vpop.f32.mrf.mxu0  ;;  %v5904_v24 = vsel %vm1510_vm2, %v1554_v7, %v1556_v3  ;;  %v1928_v7 = vrot.slane %v5907_v12, 1  ;;  %v5949_v12 = vcombine.low %v5935_v63, %v5935_v63 }
  0xec   : > { %v5879_v48 = vpop.f32.mrf.mxu1  ;;  %7071 = vst [vmem:[#allocation27_spill] sm:$0xff] %v5904_v24 }
  0xed   : > { %7067 = vst [vmem:[#allocation23_spill] sm:$0xff] %v5879_v48  ;;  %v5881_v62 = vpop.f32.mrf.mxu0  ;;  %4898 = vmatmul.mubr.msk.bf16.gmra.mxu0 %vm468_vm1, %v5867_v25  ;;  %7080 = vst [vmem:[#allocation36_spill] sm:$0xff] %v5949_v12 }
  0xee   : > { %v5885_v50 = vpop.f32.mrf.mxu1  ;;  %4848 = vmatmul.mubr.msk.bf16.gmra.mxu1 %vm468_vm1, %v5799_v40  ;;  %4901 = vmatprep.mubr.msk.bf16.mxu0 %vm468_vm1, %v5875_v36 }
  0xef   : > { %7068 = vst [vmem:[#allocation24_spill] sm:$0xff] %v5885_v50  ;;  %v5892_v18 = vpop.f32.mrf.mxu0  ;;  %4851 = vmatprep.mubr.msk.bf16.mxu1 %vm468_vm1, %v5827_v57 }
  0xf0   : > { %v5897_v42 = vpop.f32.mrf.mxu1 }
  0xf1   : > { %7069 = vst [vmem:[#allocation25_spill] sm:$0xff] %v5897_v42  ;;  %v5899_v48 = vpop.f32.mrf.mxu0 }
  0xf2   : > { %v5901_v50 = vpop.f32.mrf.mxu1 }
  0xf3   : > { %7070 = vst [vmem:[#allocation26_spill] sm:$0xff] %v5901_v50  ;;  %v5909_v30 = vpop.f32.mrf.mxu0 }
  0xf4   : > { %v5915_v37 = vpop.f32.mrf.mxu1 }
  0xf5   : > { %7074 = vst [vmem:[#allocation30_spill] sm:$0xff] %v5915_v37  ;;  %v5917_v42 = vpop.f32.mrf.mxu0  ;;  %4902 = vmatmul.mubr.msk.bf16.gmra.mxu0 %vm468_vm1, %v5904_v24  ;;  %v5932_v37 = vrot.slane %v5242_v2, 1  ;;  %v5953_v2 = vcombine.low %v1372_v13, %v1372_v13  ;;  %v1932_v13 = vrot.slane %v5949_v12, 1 }
  0xf6   : > { %v5921_v50 = vpop.f32.mrf.mxu1  ;;  %4852 = vmatmul.mubr.msk.bf16.gmra.mxu1 %vm468_vm1, %v5835_v60  ;;  %4905 = vmatprep.mubr.msk.bf16.mxu0 %vm468_vm1, %v5912_v39  ;;  %v5945_v39 = vsel %vm1510_vm2, %v1926_v58, %v1928_v7 }
  0xf7   : > { %7075 = vst [vmem:[#allocation31_spill] sm:$0xff] %v5921_v50  ;;  %v5928_v35 = vpop.f32.mrf.mxu0  ;;  %4855 = vmatprep.mubr.msk.bf16.mxu1 %vm468_vm1, %v5867_v25  ;;  %v2536_v50 = vld [vmem:[%s5431_s13] sm:$0xc]  ;;  %7079 = vst [vmem:[#allocation35_spill] sm:$0xff] %v5945_v39  ;;  %v5957_v25 = vsel %vm1510_vm2, %v1928_v7, %v5932_v37  ;;  %v1933_v12 = vsel %vm1510_vm2, %v5932_v37, %v1932_v13  ;;  %v2547_v13 = vrot.slane %v5637_v54, 2  ;;  %v3265_v54 = vsel %vm541_vm0, %v5676_v6, 0 }
  0xf8   : > { %v5937_v55 = vpop.f32.mrf.mxu1  ;;  %7081 = vst [vmem:[#allocation37_spill] sm:$0xff] %v5953_v2  ;;  %7082 = vst [vmem:[#allocation38_spill] sm:$0xff] %v5957_v25 }
  0xf9   : > { %7077 = vst [vmem:[#allocation33_spill] sm:$0xff] %v5937_v55  ;;  %v5940_v51 = vpop.f32.mrf.mxu0  ;;  %v4357_v55 = vcombine.low %v2536_v50, %v5609_v41  ;;  %v1558_v41 = vrot.slane %v5953_v2, 1 }
  0xfa   : > { %v5942_v33 = vpop.f32.mrf.mxu1 }
  0xfb   : > { %7078 = vst [vmem:[#allocation34_spill] sm:$0xff] %v5942_v33  ;;  %v5951_v47 = vpop.f32.mrf.mxu0  ;;  %v2544_v50 = vrot.slane %v4357_v55, 2 }
  0xfc   : > { %v5960_v29 = vpop.f32.mrf.mxu1 }
  0xfd   : > { %7083 = vst [vmem:[#allocation39_spill] sm:$0xff] %v5960_v29  ;;  %v5962_v33 = vpop.f32.mrf.mxu0  ;;  %4906 = vmatmul.mubr.msk.bf16.gmra.mxu0 %vm468_vm1, %v5945_v39  ;;  %v2545_v29 = vrot.slane %v5620_v46, 2 }
  0xfe   : > { %v5966_v58 = vpop.f32.mrf.mxu1  ;;  %4856 = vmatmul.mubr.msk.bf16.gmra.mxu1 %vm468_vm1, %v5875_v36  ;;  %4909 = vmatprep.mubr.msk.bf16.mxu0 %vm468_vm1, %v5957_v25  ;;  %v1559_v36 = vsel %vm1510_vm2, %v1556_v3, %v1558_v41 }
  0xff   : > { %7084 = vst [vmem:[#allocation40_spill] sm:$0xff] %v5966_v58  ;;  %v5973_v7 = vpop.f32.mrf.mxu0  ;;  %4859 = vmatprep.mubr.msk.bf16.mxu1 %vm468_vm1, %v5904_v24  ;;  %v2546_v24 = vsel %vm2543_vm3, %v2544_v50, %v2545_v29  ;;  %v2549_v50 = vrot.slane %v5613_v43, 2 }
 0x100   : > { %v5979_v39 = vpop.f32.mrf.mxu1 }
 0x101   : > { %7085 = vst [vmem:[#allocation41_spill] sm:$0xff] %v5979_v39  ;;  %v5981_v58 = vpop.f32.mrf.mxu0 }
 0x102   : > { %v5983_v63 = vpop.f32.mrf.mxu1 }
 0x103   : > { %7086 = vst [vmem:[#allocation42_spill] sm:$0xff] %v5983_v63  ;;  %v5987_v25 = vpop.f32.mrf.mxu0 }
 0x104   : > { %v5991_v2 = vpop.f32.mrf.mxu1 }
 0x105   : > { %7087 = vst [vmem:[#allocation43_spill] sm:$0xff] %v5991_v2  ;;  %v5993_v55 = vpop.f32.mrf.mxu0  ;;  %4910 = vmatmul.mubr.msk.bf16.gmra.mxu0 %vm468_vm1, %v1933_v12 }
 0x106   : > { %v5996_v46 = vpop.f32.mrf.mxu1  ;;  %4860 = vmatmul.mubr.msk.bf16.gmra.mxu1 %vm468_vm1, %v1559_v36  ;;  %4965 = vmatprep.mubr.msk.bf16.mxu0 %vm468_vm1, %v2546_v24 }
 0x107   : > { %7088 = vst [vmem:[#allocation44_spill] sm:$0xff] %v5996_v46  ;;  %v6001_v63 = vpop.f32.mrf.mxu0  ;;  %4915 = vmatprep.mubr.msk.bf16.mxu1 %vm468_vm1, %v5686_v8  ;;  %v2548_v46 = vsel %vm2543_vm3, %v2545_v29, %v2547_v13  ;;  %v2964_v8 = vsel %vm541_vm0, %v5669_v4, 0  ;;  %v2551_v29 = vrot.slane %v5616_v44, 2  ;;  %v2553_v4 = vrot.slane %v5633_v52, 2 }
 0x108   : > { %v6005_v3 = vpop.f32.mrf.mxu1 }
 0x109   : > { %7089 = vst [vmem:[#allocation45_spill] sm:$0xff] %v6005_v3  ;;  %v6007_v41 = vpop.f32.mrf.mxu0  ;;  %v2550_v3 = vsel %vm2543_vm3, %v2547_v13, %v2549_v50  ;;  %v6035_v44 = vsel %vm2543_vm3, %v2549_v50, %v2551_v29 }
 0x10a   : > { %v6010_v12 = vpop.f32.mrf.mxu1 }
 0x10b   : > { %7090 = vst [vmem:[#allocation46_spill] sm:$0xff] %v6010_v12  ;;  %v6013_v36 = vpop.f32.mrf.mxu0 }
 0x10c   : > { %v6017_v24 = vpop.f32.mrf.mxu1 }
 0x10d   : > { %7091 = vst [vmem:[#allocation47_spill] sm:$0xff] %v6017_v24  ;;  %v4767_v2 = vpop.f32.mrf.mxu0  ;;  %4966 = vmatmul.mubr.msk.bf16.vlgmr.msra.gmra.mxu0 %vm468_vm1, %v2548_v46 }
 0x10e   : > { %v4717_v43 = vpop.f32.mrf.mxu1  ;;  %4916 = vmatmul.mubr.msk.bf16.vlgmr.msra.gmra.mxu1 %vm468_vm1, %v5692_v10  ;;  %5064 = vmatpush3.bf16.msra.mxu0 %v3265_v54 }
 0x10f   : > { %v840_v12 = vadd.f32 %v4717_v43, %v5804_v45  ;;  %5014 = vmatpush3.bf16.msra.mxu1 %v2964_v8  ;;  %v1085_v6 = vpop.f32.mrf.mxu0  ;;  %4919 = vmatprep.mubr.msk.bf16.mxu1 %vm468_vm1, %v5706_v14  ;;  %v6041_v14 = vsel %vm2543_vm3, %v2551_v29, %v2553_v4 }
 0x110   : > { %v831_v24 = vpop.f32.mrf.mxu1  ;;  %4969 = vmatprep.mubr.msk.bf16.mxu0 %vm468_vm1, %v2550_v3 }
 0x111   : > { %v6031_v46 = vadd.f32 %v4767_v2, %v840_v12  ;;  %v832_v13 = vadd.f32 %v831_v24, %v5815_v49  ;;  %v4768_v10 = vpop.f32.mrf.mxu0 }
 0x112   : > { %v4718_v54 = vpop.f32.mrf.mxu1 }
 0x113   : > { %v6037_v45 = vadd.f32 %v1085_v6, %v832_v13  ;;  %v843_v8 = vadd.f32 %v4718_v54, %v5822_v53  ;;  %v1088_v43 = vpop.f32.mrf.mxu0  ;;  %v2555_v53 = vrot.slane %v5642_v56, 2 }
 0x114   : > { %v834_v52 = vpop.f32.mrf.mxu1 }
 0x115   : > { %v6043_v39 = vadd.f32 %v4768_v10, %v843_v8  ;;  %v835_v2 = vadd.f32 %v834_v52, %v5832_v59  ;;  %v4771_v3 = vpop.f32.mrf.mxu0  ;;  %4970 = vmatmul.mubr.msk.bf16.gmra.mxu0 %vm468_vm1, %v6035_v44  ;;  %v2557_v59 = vrot.slane %v5653_v61, 2  ;;  %v6063_v54 = vsel %vm2543_vm3, %v2553_v4, %v2555_v53 }
 0x116   : > { %v4721_v49 = vpop.f32.mrf.mxu1  ;;  %4920 = vmatmul.mubr.msk.bf16.gmra.mxu1 %vm468_vm1, %v5712_v16  ;;  %4973 = vmatprep.mubr.msk.bf16.mxu0 %vm468_vm1, %v6041_v14 }
 0x117   : > { %v6053_v50 = vadd.f32 %v1088_v43, %v835_v2  ;;  %v856_v12 = vadd.f32 %v4721_v49, %v5842_v1  ;;  %v1101_v24 = vpop.f32.mrf.mxu0  ;;  %4923 = vmatprep.mubr.msk.bf16.mxu1 %vm468_vm1, %v5727_v20  ;;  %v6069_v43 = vsel %vm2543_vm3, %v2555_v53, %v2557_v59 }
 0x118   : > { %v847_v29 = vpop.f32.mrf.mxu1 }
 0x119   : > { %v6059_v6 = vadd.f32 %v4771_v3, %v856_v12  ;;  %v848_v16 = vadd.f32 %v847_v29, %v5853_v5  ;;  %v4772_v13 = vpop.f32.mrf.mxu0 }
 0x11a   : > { %v4722_v10 = vpop.f32.mrf.mxu1 }
 0x11b   : > { %v6065_v56 = vadd.f32 %v1101_v24, %v848_v16  ;;  %v859_v1 = vadd.f32 %v4722_v10, %v5862_v19  ;;  %v1104_v8 = vpop.f32.mrf.mxu0  ;;  %v2559_v19 = vrot.slane %v5659_v0, 2 }
 0x11c   : > { %v850_v20 = vpop.f32.mrf.mxu1 }
 0x11d   : > { %v6071_v61 = vadd.f32 %v4772_v13, %v859_v1  ;;  %v851_v52 = vadd.f32 %v850_v20, %v5872_v31  ;;  %v4775_v2 = vpop.f32.mrf.mxu0  ;;  %4974 = vmatmul.mubr.msk.bf16.gmra.mxu0 %vm468_vm1, %v6063_v54  ;;  %v2561_v31 = vrot.slane %v5689_v9, 2  ;;  %v6091_v16 = vsel %vm2543_vm3, %v2557_v59, %v2559_v19 }
 0x11e   : > { %v4725_v5 = vpop.f32.mrf.mxu1  ;;  %4924 = vmatmul.mubr.msk.bf16.gmra.mxu1 %vm468_vm1, %v5733_v22  ;;  %4977 = vmatprep.mubr.msk.bf16.mxu0 %vm468_vm1, %v6069_v43 }
 0x11f   : > { %v6081_v4 = vadd.f32 %v1104_v8, %v851_v52  ;;  %v872_v3 = vadd.f32 %v4725_v5, %v5881_v62  ;;  %v1117_v49 = vpop.f32.mrf.mxu0  ;;  %4927 = vmatprep.mubr.msk.bf16.mxu1 %vm468_vm1, %v5749_v26  ;;  %v6097_v10 = vsel %vm2543_vm3, %v2559_v19, %v2561_v31 }
 0x120   : > { %v863_v53 = vpop.f32.mrf.mxu1 }
 0x121   : > { %v6087_v12 = vadd.f32 %v4775_v2, %v872_v3  ;;  %v864_v22 = vadd.f32 %v863_v53, %v5892_v18  ;;  %v4776_v24 = vpop.f32.mrf.mxu0 }
 0x122   : > { %v4726_v29 = vpop.f32.mrf.mxu1 }
 0x123   : > { %v6093_v0 = vadd.f32 %v1117_v49, %v864_v22  ;;  %v875_v62 = vadd.f32 %v4726_v29, %v5899_v48  ;;  %v1120_v13 = vpop.f32.mrf.mxu0  ;;  %v2563_v48 = vrot.slane %v5695_v11, 2 }
 0x124   : > { %v866_v26 = vpop.f32.mrf.mxu1 }
 0x125   : > { %v6099_v9 = vadd.f32 %v4776_v24, %v875_v62  ;;  %v867_v1 = vadd.f32 %v866_v26, %v5909_v30  ;;  %v4779_v8 = vpop.f32.mrf.mxu0  ;;  %4978 = vmatmul.mubr.msk.bf16.gmra.mxu0 %vm468_vm1, %v6091_v16  ;;  %v2565_v30 = vrot.slane %v5709_v15, 2  ;;  %v6119_v49 = vsel %vm2543_vm3, %v2561_v31, %v2563_v48 }
 0x126   : > { %v4729_v18 = vpop.f32.mrf.mxu1  ;;  %4928 = vmatmul.mubr.msk.bf16.gmra.mxu1 %vm468_vm1, %v5755_v28  ;;  %4981 = vmatprep.mubr.msk.bf16.mxu0 %vm468_vm1, %v6097_v10 }
 0x127   : > { %v6109_v59 = vadd.f32 %v1120_v13, %v867_v1  ;;  %v888_v20 = vadd.f32 %v4729_v18, %v5917_v42  ;;  %v1133_v52 = vpop.f32.mrf.mxu0  ;;  %4931 = vmatprep.mubr.msk.bf16.mxu1 %vm468_vm1, %v5771_v32  ;;  %v6125_v22 = vsel %vm2543_vm3, %v2563_v48, %v2565_v30 }
 0x128   : > { %v879_v2 = vpop.f32.mrf.mxu1 }
 0x129   : > { %v6115_v5 = vadd.f32 %v4779_v8, %v888_v20  ;;  %v880_v28 = vadd.f32 %v879_v2, %v5928_v35  ;;  %v4780_v19 = vpop.f32.mrf.mxu0 }
 0x12a   : > { %v4730_v3 = vpop.f32.mrf.mxu1 }
 0x12b   : > { %v6121_v11 = vadd.f32 %v1133_v52, %v880_v28  ;;  %v891_v42 = vadd.f32 %v4730_v3, %v5940_v51  ;;  %v1136_v53 = vpop.f32.mrf.mxu0  ;;  %v2567_v51 = vrot.slane %v5715_v17, 2 }
 0x12c   : > { %v882_v32 = vpop.f32.mrf.mxu1 }
 0x12d   : > { %v6127_v15 = vadd.f32 %v4780_v19, %v891_v42  ;;  %v883_v24 = vadd.f32 %v882_v32, %v5951_v47  ;;  %v4783_v29 = vpop.f32.mrf.mxu0  ;;  %4982 = vmatmul.mubr.msk.bf16.gmra.mxu0 %vm468_vm1, %v6119_v49  ;;  %v2569_v47 = vrot.slane %v5730_v21, 2  ;;  %v6147_v48 = vsel %vm2543_vm3, %v2565_v30, %v2567_v51 }
 0x12e   : > { %v4733_v35 = vpop.f32.mrf.mxu1  ;;  %4932 = vmatmul.mubr.msk.bf16.gmra.mxu1 %vm468_vm1, %v5777_v34  ;;  %4985 = vmatprep.mubr.msk.bf16.mxu0 %vm468_vm1, %v6125_v22 }
 0x12f   : > { %v6137_v31 = vadd.f32 %v1136_v53, %v883_v24  ;;  %v904_v62 = vadd.f32 %v4733_v35, %v5962_v33  ;;  %v1149_v13 = vpop.f32.mrf.mxu0  ;;  %4935 = vmatprep.mubr.msk.bf16.mxu1 %vm468_vm1, %v5793_v38  ;;  %v6153_v52 = vsel %vm2543_vm3, %v2567_v51, %v2569_v47 }
 0x130   : > { %v895_v26 = vpop.f32.mrf.mxu1 }
 0x131   : > { %v6143_v1 = vadd.f32 %v4783_v29, %v904_v62  ;;  %v896_v34 = vadd.f32 %v895_v26, %v5973_v7  ;;  %v4784_v8 = vpop.f32.mrf.mxu0 }
 0x132   : > { %v4734_v18 = vpop.f32.mrf.mxu1 }
 0x133   : > { %v6149_v17 = vadd.f32 %v1149_v13, %v896_v34  ;;  %v907_v33 = vadd.f32 %v4734_v18, %v5981_v58  ;;  %v1152_v20 = vpop.f32.mrf.mxu0  ;;  %v2571_v58 = vrot.slane %v5736_v23, 2  ;;  %v7093_v34 = vld [vmem:[#allocation10_spill] sm:$0xff] }
 0x134   : > { %v898_v38 = vpop.f32.mrf.mxu1 }
 0x135   : > { %v6155_v21 = vadd.f32 %v4784_v8, %v907_v33  ;;  %v899_v2 = vadd.f32 %v898_v38, %v5987_v25  ;;  %v4787_v28 = vpop.f32.mrf.mxu0  ;;  %4986 = vmatmul.mubr.msk.bf16.gmra.mxu0 %vm468_vm1, %v6147_v48  ;;  %v2573_v25 = vrot.slane %v5752_v27, 2  ;;  %v6175_v29 = vsel %vm2543_vm3, %v2569_v47, %v2571_v58  ;;  %v7094_v33 = vld [vmem:[#allocation19_spill] sm:$0xff] }
 0x136   : > { %v4737_v7 = vpop.f32.mrf.mxu1  ;;  %4936 = vmatmul.mubr.msk.bf16.gmra.mxu1 %vm468_vm1, %v5799_v40  ;;  %4989 = vmatprep.mubr.msk.bf16.mxu0 %vm468_vm1, %v6153_v52 }
 0x137   : > { %v6165_v30 = vadd.f32 %v1152_v20, %v899_v2  ;;  %v920_v19 = vadd.f32 %v4737_v7, %v5993_v55  ;;  %v1165_v3 = vpop.f32.mrf.mxu0  ;;  %4939 = vmatprep.mubr.msk.bf16.mxu1 %vm468_vm1, %v5827_v57  ;;  %v6181_v51 = vsel %vm2543_vm3, %v2571_v58, %v2573_v25 }
 0x138   : > { %v911_v42 = vpop.f32.mrf.mxu1 }
 0x139   : > { %v6171_v53 = vadd.f32 %v4787_v28, %v920_v19  ;;  %v912_v40 = vadd.f32 %v911_v42, %v6001_v63  ;;  %v4788_v32 = vpop.f32.mrf.mxu0  ;;  %v7097_v28 = vld [vmem:[#allocation11_spill] sm:$0xff]  ;;  %v7099_v42 = vld [vmem:[#allocation12_spill] sm:$0xff] }
 0x13a   : > { %v4738_v24 = vpop.f32.mrf.mxu1 }
 0x13b   : > { %v6177_v23 = vadd.f32 %v1165_v3, %v912_v40  ;;  %v923_v55 = vadd.f32 %v4738_v24, %v6007_v41  ;;  %v1168_v35 = vpop.f32.mrf.mxu0  ;;  %v7092_v41 = vld [vmem:[#allocation5_spill] sm:$0xff] }
 0x13c   : > { %v914_v57 = vpop.f32.mrf.mxu1  ;;  %v2575_v47 = vrot.slane %v7092_v41, 2  ;;  %v7103_v41 = vld [vmem:[#allocation7_spill] sm:$0xff] }
 0x13d   : > { %v6183_v27 = vadd.f32 %v4788_v32, %v923_v55  ;;  %v915_v62 = vadd.f32 %v914_v57, %v6013_v36  ;;  %v4791_v13 = vpop.f32.mrf.mxu0  ;;  %4990 = vmatmul.mubr.msk.bf16.gmra.mxu0 %vm468_vm1, %v6175_v29  ;;  %v7095_v36 = vld [vmem:[#allocation6_spill] sm:$0xff]  ;;  %v7101_v57 = vld [vmem:[#allocation15_spill] sm:$0xff] }
 0x13e   : > { %v4741_v63 = vpop.f32.mrf.mxu1  ;;  %4940 = vmatmul.mubr.msk.bf16.gmra.mxu1 %vm468_vm1, %v5835_v60  ;;  %4993 = vmatprep.mubr.msk.bf16.mxu0 %vm468_vm1, %v6181_v51  ;;  %v2577_v20 = vrot.slane %v7095_v36, 2  ;;  %v6203_v19 = vsel %vm2543_vm3, %v2573_v25, %v2575_v47  ;;  %v7106_v36 = vld [vmem:[#allocation27_spill] sm:$0xff] }
 0x13f   : > { %v6193_v26 = vadd.f32 %v1168_v35, %v915_v62  ;;  %v936_v8 = vadd.f32 %v4741_v63, %v7093_v34  ;;  %v1181_v18 = vpop.f32.mrf.mxu0  ;;  %4943 = vmatprep.mubr.msk.bf16.mxu1 %vm468_vm1, %v7094_v33  ;;  %v7102_v63 = vld [vmem:[#allocation21_spill] sm:$0xff] }
 0x140   : > { %v927_v38 = vpop.f32.mrf.mxu1  ;;  %v6209_v24 = vsel %vm2543_vm3, %v2575_v47, %v2577_v20  ;;  %v2579_v47 = vrot.slane %v7103_v41, 2 }
 0x141   : > { %v6199_v2 = vadd.f32 %v4791_v13, %v936_v8  ;;  %v928_v60 = vadd.f32 %v927_v38, %v7097_v28  ;;  %v4792_v7 = vpop.f32.mrf.mxu0  ;;  %v7105_v8 = vld [vmem:[#allocation16_spill] sm:$0xff] }
 0x142   : > { %v4742_v58 = vpop.f32.mrf.mxu1  ;;  %v7107_v38 = vld [vmem:[#allocation8_spill] sm:$0xff] }
 0x143   : > { %7096 = vst [vmem:[#allocation5_spill] sm:$0xff] %v6199_v2  ;;  %v6205_v3 = vadd.f32 %v1181_v18, %v928_v60  ;;  %v939_v40 = vadd.f32 %v4742_v58, %v7099_v42  ;;  %v1184_v32 = vpop.f32.mrf.mxu0  ;;  %v2581_v28 = vrot.slane %v7107_v38, 2  ;;  %v7109_v58 = vld [vmem:[#allocation17_spill] sm:$0xff]  ;;  %v7112_v38 = vld [vmem:[#allocation32_spill] sm:$0xff] }
 0x144   : > { %v930_v55 = vpop.f32.mrf.mxu1  ;;  %v7137_v2 = vld [vmem:[#allocation33_spill] sm:$0xff] }
 0x145   : > { %7098 = vst [vmem:[#allocation10_spill] sm:$0xff] %v6205_v3  ;;  %v6211_v35 = vadd.f32 %v4792_v7, %v939_v40  ;;  %v931_v62 = vadd.f32 %v930_v55, %v7101_v57  ;;  %v4795_v13 = vpop.f32.mrf.mxu0  ;;  %4994 = vmatmul.mubr.msk.bf16.gmra.mxu0 %vm468_vm1, %v6203_v19  ;;  %v1379_v55 = vld [vmem:[%s5431_s13 + $0xdc] sm:$0xf] }
 0x146   : > { %v4745_v25 = vpop.f32.mrf.mxu1  ;;  %4944 = vmatmul.mubr.msk.bf16.gmra.mxu1 %vm468_vm1, %v7102_v63  ;;  %4997 = vmatprep.mubr.msk.bf16.mxu0 %vm468_vm1, %v6209_v24  ;;  %v6232_v63 = vsel %vm2543_vm3, %v2577_v20, %v2579_v47 }
 0x147   : > { %7100 = vst [vmem:[#allocation19_spill] sm:$0xff] %v6211_v35  ;;  %v6221_v34 = vadd.f32 %v1184_v32, %v931_v62  ;;  %v952_v18 = vadd.f32 %v4745_v25, %v7105_v8  ;;  %v1197_v33 = vpop.f32.mrf.mxu0  ;;  %4947 = vmatprep.mubr.msk.bf16.mxu1 %vm468_vm1, %v7106_v36  ;;  %v7111_v62 = vld [vmem:[#allocation18_spill] sm:$0xff]  ;;  %v6238_v8 = vsel %vm2543_vm3, %v2579_v47, %v2581_v28  ;;  %v7117_v47 = vld [vmem:[#allocation9_spill] sm:$0xff] }
 0x148   : > { %v943_v60 = vpop.f32.mrf.mxu1 }
 0x149   : > { %7104 = vst [vmem:[#allocation6_spill] sm:$0xff] %v6221_v34  ;;  %v6227_v7 = vadd.f32 %v4795_v13, %v952_v18  ;;  %v944_v42 = vadd.f32 %v943_v60, %v7109_v58  ;;  %v4796_v40 = vpop.f32.mrf.mxu0  ;;  %v6241_v13 = vcombine.low %v7112_v38, %v1379_v55  ;;  %v7115_v60 = vld [vmem:[#allocation23_spill] sm:$0xff]  ;;  %v7119_v55 = vld [vmem:[#allocation24_spill] sm:$0xff] }
 0x14a   : > { %v4746_v57 = vpop.f32.mrf.mxu1 }
 0x14b   : > { %7108 = vst [vmem:[#allocation11_spill] sm:$0xff] %v6227_v7  ;;  %v6234_v32 = vadd.f32 %v1197_v33, %v944_v42  ;;  %v955_v25 = vadd.f32 %v4746_v57, %v7111_v62  ;;  %v1200_v41 = vpop.f32.mrf.mxu0  ;;  %7113 = vst [vmem:[#allocation15_spill] sm:$0xff] %v6241_v13  ;;  %v7116_v33 = vld [vmem:[#allocation29_spill] sm:$0xff]  ;;  %v2583_v42 = vrot.slane %v7117_v47, 2 }
 0x14c   : > { %v946_v36 = vpop.f32.mrf.mxu1 }
 0x14d   : > { %7110 = vst [vmem:[#allocation12_spill] sm:$0xff] %v6234_v32  ;;  %v6243_v18 = vadd.f32 %v4796_v40, %v955_v25  ;;  %v947_v58 = vadd.f32 %v946_v36, %v7115_v60  ;;  %v4799_v7 = vpop.f32.mrf.mxu0  ;;  %4998 = vmatmul.mubr.msk.bf16.gmra.mxu0 %vm468_vm1, %v6232_v63  ;;  %v7120_v25 = vld [vmem:[#allocation35_spill] sm:$0xff]  ;;  %v7121_v36 = vld [vmem:[#allocation13_spill] sm:$0xff] }
 0x14e   : > { %v4749_v20 = vpop.f32.mrf.mxu1  ;;  %4948 = vmatmul.mubr.msk.bf16.gmra.mxu1 %vm468_vm1, %v7116_v33  ;;  %5001 = vmatprep.mubr.msk.bf16.mxu0 %vm468_vm1, %v6238_v8  ;;  %v2585_v38 = vrot.slane %v7121_v36, 2  ;;  %v2240_v33 = vrot.slane %v6241_v13, 1  ;;  %v7123_v32 = vld [vmem:[#allocation25_spill] sm:$0xff] }
 0x14f   : > { %7114 = vst [vmem:[#allocation21_spill] sm:$0xff] %v6243_v18  ;;  %v6253_v57 = vadd.f32 %v1200_v41, %v947_v58  ;;  %v968_v40 = vadd.f32 %v4749_v20, %v7119_v55  ;;  %v1213_v62 = vpop.f32.mrf.mxu0  ;;  %4951 = vmatprep.mubr.msk.bf16.mxu1 %vm468_vm1, %v7120_v25  ;;  %v6264_v58 = vsel %vm2543_vm3, %v2581_v28, %v2583_v42  ;;  %v7125_v55 = vld [vmem:[#allocation26_spill] sm:$0xff]  ;;  %v6273_v36 = vld [vmem:[%s5431_s13 + $0xe0] sm:$0xff]  }
 0x150   : > { %v959_v60 = vpop.f32.mrf.mxu1  ;;  %v6270_v35 = vsel %vm2543_vm3, %v2583_v42, %v2585_v38  ;;  %7127 = vst [vmem:[#allocation17_spill] sm:$0xff] %v6273_v36  ;;  %v7130_v28 = vld [vmem:[#allocation30_spill] sm:$0xff] }
 0x151   : > { %7118 = vst [vmem:[#allocation7_spill] sm:$0xff] %v6253_v57  ;;  %v6260_v18 = vadd.f32 %v4799_v7, %v968_v40  ;;  %v960_v34 = vadd.f32 %v959_v60, %v7123_v32  ;;  %v4800_v47 = vpop.f32.mrf.mxu0  ;;  %7126 = vst [vmem:[#allocation8_spill] sm:$0xff] %v6270_v35  ;;  %v2241_v7 = vsel %vm1510_vm2, %v5932_v37, %v2240_v33  ;;  %v6278_v32 = vld [vmem:[%s5431_s13 + $0xe8] sm:$0xff]  }
 0x152   : > { %v4750_v41 = vpop.f32.mrf.mxu1  ;;  %7128 = vst [vmem:[#allocation18_spill] sm:$0xff] %v6278_v32  ;;  %v7132_v42 = vld [vmem:[#allocation14_spill] sm:$0xff] }
 0x153   : > { %7122 = vst [vmem:[#allocation16_spill] sm:$0xff] %v6260_v18  ;;  %v6266_v20 = vadd.f32 %v1213_v62, %v960_v34  ;;  %v971_v57 = vadd.f32 %v4750_v41, %v7125_v55  ;;  %v1216_v25 = vpop.f32.mrf.mxu0  ;;  %v7131_v41 = vld [vmem:[#allocation38_spill] sm:$0xff]  ;;  %v2587_v55 = vrot.slane %v7132_v42, 2 }
 0x154   : > { %v962_v13 = vpop.f32.mrf.mxu1 }
 0x155   : > { %7124 = vst [vmem:[#allocation27_spill] sm:$0xff] %v6266_v20  ;;  %v6280_v40 = vadd.f32 %v4800_v47, %v971_v57  ;;  %v963_v60 = vadd.f32 %v962_v13, %v7130_v28  ;;  %v4803_v34 = vpop.f32.mrf.mxu0  ;;  %5002 = vmatmul.mubr.msk.bf16.gmra.mxu0 %vm468_vm1, %v6264_v58  ;;  %v7134_v20 = vld [vmem:[#allocation31_spill] sm:$0xff]  ;;  %v2242_v13 = vrot.slane %v6273_v36, 1  ;;  %v7135_v28 = vld [vmem:[#allocation20_spill] sm:$0xff] }
 0x156   : > { %v4753_v62 = vpop.f32.mrf.mxu1  ;;  %4952 = vmatmul.mubr.msk.bf16.gmra.mxu1 %vm468_vm1, %v7131_v41  ;;  %5005 = vmatprep.mubr.msk.bf16.mxu0 %vm468_vm1, %v6270_v35  ;;  %v2244_v41 = vrot.slane %v6278_v32, 1  ;;  %v7143_v32 = vld [vmem:[#allocation39_spill] sm:$0xff] }
 0x157   : > { %7129 = vst [vmem:[#allocation32_spill] sm:$0xff] %v6280_v40  ;;  %v6290_v37 = vadd.f32 %v1216_v25, %v963_v60  ;;  %v984_v57 = vadd.f32 %v4753_v62, %v7134_v20  ;;  %v1229_v47 = vpop.f32.mrf.mxu0  ;;  %4955 = vmatprep.mubr.msk.bf16.mxu1 %vm468_vm1, %v2241_v7  ;;  %v6296_v40 = vrot.slane %v7135_v28, 2  ;;  %v6303_v20 = vsel %vm2543_vm3, %v2585_v38, %v2587_v55  ;;  %v7140_v7 = vld [vmem:[#allocation34_spill] sm:$0xff] }
 0x158   : > { %v975_v18 = vpop.f32.mrf.mxu1  ;;  %7138 = vst [vmem:[#allocation9_spill] sm:$0xff] %v6303_v20  ;;  %v2243_v28 = vsel %vm1510_vm2, %v2240_v33, %v2242_v13  ;;  %v7144_v33 = vld [vmem:[#allocation37_spill] sm:$0xff] }
 0x159   : > { %7133 = vst [vmem:[#allocation23_spill] sm:$0xff] %v6290_v37  ;;  %v6299_v3 = vadd.f32 %v4803_v34, %v984_v57  ;;  %v976_v42 = vadd.f32 %v975_v18, %v7137_v2  ;;  %v4804_v25 = vpop.f32.mrf.mxu0  ;;  %v6311_v35 = vsel %vm2543_vm3, %v2587_v55, %v6296_v40  ;;  %v5248_v34 = vld [vmem:[%s5431_s13 + $0xf0] ss:$0 sps:$4 sm:$0x11]   ;;  %v2245_v2 = vsel %vm1510_vm2, %v2242_v13, %v2244_v41 }
 0x15a   : > { %v4754_v60 = vpop.f32.mrf.mxu1  ;;  %7141 = vst [vmem:[#allocation35_spill] sm:$0xff] %v6311_v35  ;;  %v2591_v55 = vrot.slane %v7144_v33, 2 }
 0x15b   : > { %7136 = vst [vmem:[#allocation29_spill] sm:$0xff] %v6299_v3  ;;  %v6305_v62 = vadd.f32 %v1229_v47, %v976_v42  ;;  %v987_v37 = vadd.f32 %v4754_v60, %v7140_v7  ;;  %v1232_v36 = vpop.f32.mrf.mxu0  ;;  %v7145_v60 = vld [vmem:[#allocation40_spill] sm:$0xff] }
 0x15c   : > { %v978_v57 = vpop.f32.mrf.mxu1 }
 0x15d   : > { %7139 = vst [vmem:[#allocation24_spill] sm:$0xff] %v6305_v62  ;;  %v6315_v18 = vadd.f32 %v4804_v25, %v987_v37  ;;  %v979_v38 = vadd.f32 %v978_v57, %v7143_v32  ;;  %v4807_v3 = vpop.f32.mrf.mxu0  ;;  %5006 = vmatmul.mubr.msk.bf16.gmra.mxu0 %vm468_vm1, %v6303_v20  ;;  %v2246_v32 = vrot.slane %v5248_v34, 1  ;;  %v7146_v57 = vld [vmem:[#allocation41_spill] sm:$0xff]  ;;  %v7148_v34 = vld [vmem:[#allocation43_spill] sm:$0xff] }
 0x15e   : > { %v4757_v47 = vpop.f32.mrf.mxu1  ;;  %4956 = vmatmul.mubr.msk.bf16.gmra.mxu1 %vm468_vm1, %v2243_v28  ;;  %5009 = vmatprep.mubr.msk.bf16.mxu0 %vm468_vm1, %v6311_v35  ;;  %v2592_v35 = vsel %vm2543_vm3, %v6296_v40, %v2591_v55  ;;  %v7150_v55 = vld [vmem:[#allocation44_spill] sm:$0xff] }
 0x15f   : > { %7142 = vst [vmem:[#allocation13_spill] sm:$0xff] %v6315_v18  ;;  %v6324_v42 = vadd.f32 %v1232_v36, %v979_v38  ;;  %v1000_v13 = vadd.f32 %v4757_v47, %v7145_v60  ;;  %v1245_v37 = vpop.f32.mrf.mxu0  ;;  %4959 = vmatprep.mubr.msk.bf16.mxu1 %vm468_vm1, %v2245_v2  ;;  %v7147_v36 = vld [vmem:[#allocation42_spill] sm:$0xff]  ;;  %v2247_v47 = vsel %vm1510_vm2, %v2244_v41, %v2246_v32  ;;  %v7151_v32 = vld [vmem:[#allocation45_spill] sm:$0xff] }
 0x160   : > { %v991_v25 = vpop.f32.mrf.mxu1 }
 0x161   : > { %v6328_v7 = vadd.f32 %v4807_v3, %v1000_v13  ;;  %v992_v18 = vadd.f32 %v991_v25, %v7146_v57  ;;  %v4808_v62 = vpop.f32.mrf.mxu0 }
 0x162   : > { %v4758_v28 = vpop.f32.mrf.mxu1 }
 0x163   : > { %v6333_v20 = vadd.f32 %v1245_v37, %v992_v18  ;;  %v1003_v38 = vadd.f32 %v4758_v28, %v7147_v36  ;;  %v1248_v33 = vpop.f32.mrf.mxu0 }
 0x164   : > { %v994_v60 = vpop.f32.mrf.mxu1 }
 0x165   : > { %v6337_v2 = vadd.f32 %v4808_v62, %v1003_v38  ;;  %v995_v3 = vadd.f32 %v994_v60, %v7148_v34  ;;  %v4811_v13 = vpop.f32.mrf.mxu0  ;;  %5010 = vmatmul.mubr.msk.bf16.gmra.mxu0 %vm468_vm1, %v2592_v35 }
 0x166   : > { %v4761_v25 = vpop.f32.mrf.mxu1  ;;  %4960 = vmatmul.mubr.msk.bf16.gmra.mxu1 %vm468_vm1, %v2247_v47  ;;  %5065 = vmatprep.mubr.msk.bf16.mxu0 %vm468_vm1, %v6069_v43  ;;  %v7152_v47 = vld [vmem:[#allocation46_spill] sm:$0xff] }
 0x167   : > { %v6344_v18 = vadd.f32 %v1248_v33, %v995_v3  ;;  %v1016_v37 = vadd.f32 %v4761_v25, %v7150_v55  ;;  %v1261_v57 = vpop.f32.mrf.mxu0  ;;  %5015 = vmatprep.mubr.msk.bf16.mxu1 %vm468_vm1, %v6035_v44  ;;  %v7153_v25 = vld [vmem:[#allocation47_spill] sm:$0xff] }
 0x168   : > { %v1007_v41 = vpop.f32.mrf.mxu1 }
 0x169   : > { %7149 = vst [vmem:[#allocation25_spill] sm:$0xff] %v6344_v18  ;;  %v6349_v62 = vadd.f32 %v4811_v13, %v1016_v37  ;;  %v1008_v28 = vadd.f32 %v1007_v41, %v7151_v32  ;;  %v4812_v35 = vpop.f32.mrf.mxu0 }
 0x16a   : > { %v4762_v36 = vpop.f32.mrf.mxu1 }
 0x16b   : > { %v6352_v38 = vadd.f32 %v1261_v57, %v1008_v28  ;;  %v1019_v60 = vadd.f32 %v4762_v36, %v7152_v47  ;;  %v1264_v34 = vpop.f32.mrf.mxu0 }
 0x16c   : > { %v1010_v33 = vpop.f32.mrf.mxu1 }
 0x16d   : > { %v6355_v3 = vadd.f32 %v4812_v35, %v1019_v60  ;;  %v1011_v55 = vadd.f32 %v1010_v33, %v7153_v25  ;;  %v4867_v18 = vpop.f32.mrf.mxu0  ;;  %5066 = vmatmul.mubr.msk.bf16.vlgmr.msra.gmra.mxu0 %vm468_vm1, %v6091_v16 }
 0x16e   : > { %v4817_v44 = vpop.f32.mrf.mxu1  ;;  %5016 = vmatmul.mubr.msk.bf16.vlgmr.msra.gmra.mxu1 %vm468_vm1, %v6041_v14  ;;  %5069 = vmatprep.mubr.msk.bf16.mxu0 %vm468_vm1, %v6097_v10 }
 0x16f   : > { %v6364_v13 = vadd.f32 %v1264_v34, %v1011_v55  ;;  %v1862_v37 = vadd.f32 %v4817_v44, %v6031_v46  ;;  %v1983_v57 = vpop.f32.mrf.mxu0  ;;  %5019 = vmatprep.mubr.msk.bf16.mxu1 %vm468_vm1, %v6063_v54 }
 0x170   : > { %v1669_v41 = vpop.f32.mrf.mxu1 }
 0x171   : > { %v6369_v32 = vadd.f32 %v4867_v18, %v1862_v37  ;;  %v1860_v28 = vadd.f32 %v1669_v41, %v6037_v45  ;;  %v4868_v35 = vpop.f32.mrf.mxu0 }
 0x172   : > { %v4818_v36 = vpop.f32.mrf.mxu1 }
 0x173   : > { %v6372_v47 = vadd.f32 %v1983_v57, %v1860_v28  ;;  %v1863_v14 = vadd.f32 %v4818_v36, %v6043_v39  ;;  %v1986_v60 = vpop.f32.mrf.mxu0 }
 0x174   : > { %v1672_v34 = vpop.f32.mrf.mxu1 }
 0x175   : > { %v6375_v33 = vadd.f32 %v4868_v35, %v1863_v14  ;;  %v1861_v46 = vadd.f32 %v1672_v34, %v6053_v50  ;;  %v4871_v25 = vpop.f32.mrf.mxu0  ;;  %5070 = vmatmul.mubr.msk.bf16.gmra.mxu0 %vm468_vm1, %v6119_v49 }
 0x176   : > { %v4821_v54 = vpop.f32.mrf.mxu1  ;;  %5020 = vmatmul.mubr.msk.bf16.gmra.mxu1 %vm468_vm1, %v6069_v43  ;;  %5073 = vmatprep.mubr.msk.bf16.mxu0 %vm468_vm1, %v6125_v22 }
 0x177   : > { %v6384_v45 = vadd.f32 %v1986_v60, %v1861_v46  ;;  %v1866_v39 = vadd.f32 %v4821_v54, %v6059_v6  ;;  %v1999_v18 = vpop.f32.mrf.mxu0  ;;  %5023 = vmatprep.mubr.msk.bf16.mxu1 %vm468_vm1, %v6091_v16 }
 0x178   : > { %v1685_v50 = vpop.f32.mrf.mxu1 }
 0x179   : > { %v6389_v55 = vadd.f32 %v4871_v25, %v1866_v39  ;;  %v1864_v44 = vadd.f32 %v1685_v50, %v6065_v56  ;;  %v4872_v37 = vpop.f32.mrf.mxu0 }
 0x17a   : > { %v4822_v57 = vpop.f32.mrf.mxu1 }
 0x17b   : > { %v6392_v41 = vadd.f32 %v1999_v18, %v1864_v44  ;;  %v1867_v43 = vadd.f32 %v4822_v57, %v6071_v61  ;;  %v2002_v28 = vpop.f32.mrf.mxu0 }
 0x17c   : > { %v1688_v35 = vpop.f32.mrf.mxu1 }
 0x17d   : > { %v6395_v36 = vadd.f32 %v4872_v37, %v1867_v43  ;;  %v1865_v6 = vadd.f32 %v1688_v35, %v6081_v4  ;;  %v4875_v14 = vpop.f32.mrf.mxu0  ;;  %5074 = vmatmul.mubr.msk.bf16.gmra.mxu0 %vm468_vm1, %v6147_v48 }
 0x17e   : > { %v4825_v16 = vpop.f32.mrf.mxu1  ;;  %5024 = vmatmul.mubr.msk.bf16.gmra.mxu1 %vm468_vm1, %v6097_v10  ;;  %5077 = vmatprep.mubr.msk.bf16.mxu0 %vm468_vm1, %v6153_v52 }
 0x17f   : > { %v6404_v56 = vadd.f32 %v2002_v28, %v1865_v6  ;;  %v1870_v61 = vadd.f32 %v4825_v16, %v6087_v12  ;;  %v2015_v60 = vpop.f32.mrf.mxu0  ;;  %5027 = vmatprep.mubr.msk.bf16.mxu1 %vm468_vm1, %v6119_v49 }
 0x180   : > { %v1701_v4 = vpop.f32.mrf.mxu1 }
 0x181   : > { %v6409_v34 = vadd.f32 %v4875_v14, %v1870_v61  ;;  %v1868_v46 = vadd.f32 %v1701_v4, %v6093_v0  ;;  %v4876_v25 = vpop.f32.mrf.mxu0 }
 0x182   : > { %v4826_v54 = vpop.f32.mrf.mxu1 }
 0x183   : > { %v6412_v39 = vadd.f32 %v2015_v60, %v1868_v46  ;;  %v1871_v10 = vadd.f32 %v4826_v54, %v6099_v9  ;;  %v2018_v18 = vpop.f32.mrf.mxu0 }
 0x184   : > { %v1704_v50 = vpop.f32.mrf.mxu1 }
 0x185   : > { %v6415_v44 = vadd.f32 %v4876_v25, %v1871_v10  ;;  %v1869_v12 = vadd.f32 %v1704_v50, %v6109_v59  ;;  %v4879_v37 = vpop.f32.mrf.mxu0  ;;  %5078 = vmatmul.mubr.msk.bf16.gmra.mxu0 %vm468_vm1, %v6175_v29 }
 0x186   : > { %v4829_v49 = vpop.f32.mrf.mxu1  ;;  %5028 = vmatmul.mubr.msk.bf16.gmra.mxu1 %vm468_vm1, %v6125_v22  ;;  %5081 = vmatprep.mubr.msk.bf16.mxu0 %vm468_vm1, %v6181_v51 }
 0x187   : > { %v6424_v0 = vadd.f32 %v2018_v18, %v1869_v12  ;;  %v1874_v9 = vadd.f32 %v4829_v49, %v6115_v5  ;;  %v2031_v57 = vpop.f32.mrf.mxu0  ;;  %5031 = vmatprep.mubr.msk.bf16.mxu1 %vm468_vm1, %v6147_v48 }
 0x188   : > { %v1717_v59 = vpop.f32.mrf.mxu1 }
 0x189   : > { %v6429_v43 = vadd.f32 %v4879_v37, %v1874_v9  ;;  %v1872_v28 = vadd.f32 %v1717_v59, %v6121_v11  ;;  %v4880_v35 = vpop.f32.mrf.mxu0 }
 0x18a   : > { %v4830_v6 = vpop.f32.mrf.mxu1 }
 0x18b   : > { %v6432_v14 = vadd.f32 %v2031_v57, %v1872_v28  ;;  %v1875_v22 = vadd.f32 %v4830_v6, %v6127_v15  ;;  %v2034_v16 = vpop.f32.mrf.mxu0 }
 0x18c   : > { %v1720_v61 = vpop.f32.mrf.mxu1 }
 0x18d   : > { %v6435_v60 = vadd.f32 %v4880_v35, %v1875_v22  ;;  %v1873_v5 = vadd.f32 %v1720_v61, %v6137_v31  ;;  %v4883_v4 = vpop.f32.mrf.mxu0  ;;  %5082 = vmatmul.mubr.msk.bf16.gmra.mxu0 %vm468_vm1, %v6203_v19 }
 0x18e   : > { %v4833_v48 = vpop.f32.mrf.mxu1  ;;  %5032 = vmatmul.mubr.msk.bf16.gmra.mxu1 %vm468_vm1, %v6153_v52  ;;  %5085 = vmatprep.mubr.msk.bf16.mxu0 %vm468_vm1, %v6209_v24 }
 0x18f   : > { %v6444_v11 = vadd.f32 %v2034_v16, %v1873_v5  ;;  %v1878_v15 = vadd.f32 %v4833_v48, %v6143_v1  ;;  %v2047_v46 = vpop.f32.mrf.mxu0  ;;  %5035 = vmatprep.mubr.msk.bf16.mxu1 %vm468_vm1, %v6175_v29 }
 0x190   : > { %v1733_v31 = vpop.f32.mrf.mxu1 }
 0x191   : > { %v6449_v25 = vadd.f32 %v4883_v4, %v1878_v15  ;;  %v1876_v54 = vadd.f32 %v1733_v31, %v6149_v17  ;;  %v4884_v10 = vpop.f32.mrf.mxu0 }
 0x192   : > { %v4834_v18 = vpop.f32.mrf.mxu1 }
 0x193   : > { %v6452_v50 = vadd.f32 %v2047_v46, %v1876_v54  ;;  %v1879_v52 = vadd.f32 %v4834_v18, %v6155_v21  ;;  %v2050_v12 = vpop.f32.mrf.mxu0  ;;  %v7156_v54 = vld [vmem:[#allocation10_spill] sm:$0xff] }
 0x194   : > { %v1736_v37 = vpop.f32.mrf.mxu1 }
 0x195   : > { %v6455_v49 = vadd.f32 %v4884_v10, %v1879_v52  ;;  %v1877_v1 = vadd.f32 %v1736_v37, %v6165_v30  ;;  %v4887_v9 = vpop.f32.mrf.mxu0  ;;  %5086 = vmatmul.mubr.msk.bf16.gmra.mxu0 %vm468_vm1, %v6232_v63 }
 0x196   : > { %v4837_v29 = vpop.f32.mrf.mxu1  ;;  %5036 = vmatmul.mubr.msk.bf16.gmra.mxu1 %vm468_vm1, %v6181_v51  ;;  %5089 = vmatprep.mubr.msk.bf16.mxu0 %vm468_vm1, %v6238_v8 }
 0x197   : > { %v6464_v17 = vadd.f32 %v2050_v12, %v1877_v1  ;;  %v1882_v21 = vadd.f32 %v4837_v29, %v6171_v53  ;;  %v2063_v57 = vpop.f32.mrf.mxu0  ;;  %5039 = vmatprep.mubr.msk.bf16.mxu1 %vm468_vm1, %v6203_v19 }
 0x198   : > { %v1749_v30 = vpop.f32.mrf.mxu1 }
 0x199   : > { %v6469_v59 = vadd.f32 %v4887_v9, %v1882_v21  ;;  %v1880_v28 = vadd.f32 %v1749_v30, %v6177_v23  ;;  %v4888_v35 = vpop.f32.mrf.mxu0  ;;  %v7154_v23 = vld [vmem:[#allocation8_spill] sm:$0xff]  ;;  %v7158_v21 = vld [vmem:[#allocation6_spill] sm:$0xff] }
 0x19a   : > { %v4838_v6 = vpop.f32.mrf.mxu1 }
 0x19b   : > { %v6472_v22 = vadd.f32 %v2063_v57, %v1880_v28  ;;  %v1883_v51 = vadd.f32 %v4838_v6, %v6183_v27  ;;  %v2066_v16 = vpop.f32.mrf.mxu0  ;;  %v7155_v27 = vld [vmem:[#allocation5_spill] sm:$0xff]  ;;  %v7161_v6 = vld [vmem:[#allocation22_spill] sm:$0xff] }
 0x19c   : > { %v1752_v61 = vpop.f32.mrf.mxu1  ;;  %v7159_v28 = vld [vmem:[#allocation9_spill] sm:$0xff] }
 0x19d   : > { %v6475_v5 = vadd.f32 %v4888_v35, %v1883_v51  ;;  %v1881_v53 = vadd.f32 %v1752_v61, %v6193_v26  ;;  %v4891_v4 = vpop.f32.mrf.mxu0  ;;  %5090 = vmatmul.mubr.msk.bf16.gmra.mxu0 %vm468_vm1, %v6264_v58  ;;  %v7160_v35 = vld [vmem:[#allocation35_spill] sm:$0xff]  ;;  %v2943_v51 = vrot.slane %v7161_v6, 2 }
 0x19e   : > { %v4841_v19 = vpop.f32.mrf.mxu1  ;;  %5040 = vmatmul.mubr.msk.bf16.gmra.mxu1 %vm468_vm1, %v6209_v24  ;;  %5093 = vmatprep.mubr.msk.bf16.mxu0 %vm468_vm1, %v7154_v23  ;;  %v7157_v24 = vld [vmem:[#allocation19_spill] sm:$0xff] }
 0x19f   : > { %v6484_v48 = vadd.f32 %v2066_v16, %v1881_v53  ;;  %v1886_v15 = vadd.f32 %v4841_v19, %v7155_v27  ;;  %v2079_v46 = vpop.f32.mrf.mxu0  ;;  %5043 = vmatprep.mubr.msk.bf16.mxu1 %vm468_vm1, %v6232_v63  ;;  %v7162_v61 = vld [vmem:[#allocation11_spill] sm:$0xff]  ;;  %v7163_v19 = vld [vmem:[#allocation28_spill] sm:$0xff] }
 0x1a0   : > { %v1765_v26 = vpop.f32.mrf.mxu1  ;;  %v2945_v27 = vrot.slane %v7163_v19, 2 }
 0x1a1   : > { %v6489_v31 = vadd.f32 %v4891_v4, %v1886_v15  ;;  %v1884_v10 = vadd.f32 %v1765_v26, %v7156_v54  ;;  %v4892_v18 = vpop.f32.mrf.mxu0  ;;  %v7164_v26 = vld [vmem:[#allocation12_spill] sm:$0xff] }
 0x1a2   : > { %v4842_v52 = vpop.f32.mrf.mxu1 }
 0x1a3   : > { %v6492_v12 = vadd.f32 %v2079_v46, %v1884_v10  ;;  %v1887_v37 = vadd.f32 %v4842_v52, %v7157_v24  ;;  %v2082_v1 = vpop.f32.mrf.mxu0  ;;  %v7165_v24 = vld [vmem:[#allocation21_spill] sm:$0xff] }
 0x1a4   : > { %v1768_v9 = vpop.f32.mrf.mxu1 }
 0x1a5   : > { %v6495_v29 = vadd.f32 %v4892_v18, %v1887_v37  ;;  %v1885_v57 = vadd.f32 %v1768_v9, %v7158_v21  ;;  %v4895_v30 = vpop.f32.mrf.mxu0  ;;  %5094 = vmatmul.mubr.msk.bf16.gmra.mxu0 %vm468_vm1, %v7159_v28  ;;  %v2944_v18 = vsel %vm2543_vm3, %v6296_v40, %v2943_v51  ;;  %v5250_v40 = vld [vmem:[%s5431_s13 + $0xd0] sm:$0xff]  }
 0x1a6   : > { %v4845_v63 = vpop.f32.mrf.mxu1  ;;  %5044 = vmatmul.mubr.msk.bf16.gmra.mxu1 %vm468_vm1, %v6238_v8  ;;  %5097 = vmatprep.mubr.msk.bf16.mxu0 %vm468_vm1, %v7160_v35 }
 0x1a7   : > { %v6505_v16 = vadd.f32 %v2082_v1, %v1885_v57  ;;  %v1890_v53 = vadd.f32 %v4845_v63, %v7162_v61  ;;  %v2095_v4 = vpop.f32.mrf.mxu0  ;;  %5047 = vmatprep.mubr.msk.bf16.mxu1 %vm468_vm1, %v6264_v58  ;;  %v2946_v58 = vsel %vm2543_vm3, %v2943_v51, %v2945_v27  ;;  %v7166_v57 = vld [vmem:[#allocation7_spill] sm:$0xff]  ;;  %v6528_v61 = vrot.slane %v5250_v40, 2  ;;  %v7168_v51 = vld [vmem:[#allocation16_spill] sm:$0xff] }
 0x1a8   : > { %v1781_v15 = vpop.f32.mrf.mxu1 }
 0x1a9   : > { %v6511_v46 = vadd.f32 %v4895_v30, %v1890_v53  ;;  %v1888_v8 = vadd.f32 %v1781_v15, %v7164_v26  ;;  %v4896_v54 = vpop.f32.mrf.mxu0  ;;  %v7169_v15 = vld [vmem:[#allocation15_spill] sm:$0xff] }
 0x1aa   : > { %v4846_v10 = vpop.f32.mrf.mxu1  ;;  %v3244_v26 = vrot.slane %v7169_v15, 2 }
 0x1ab   : > { %v6516_v52 = vadd.f32 %v2095_v4, %v1888_v8  ;;  %v1891_v37 = vadd.f32 %v4846_v10, %v7165_v24  ;;  %v2098_v1 = vpop.f32.mrf.mxu0  ;;  %v7171_v10 = vld [vmem:[#allocation27_spill] sm:$0xff] }
 0x1ac   : > { %v1784_v9 = vpop.f32.mrf.mxu1 }
 0x1ad   : > { %v6520_v21 = vadd.f32 %v4896_v54, %v1891_v37  ;;  %v1889_v30 = vadd.f32 %v1784_v9, %v7166_v57  ;;  %v4899_v63 = vpop.f32.mrf.mxu0  ;;  %5098 = vmatmul.mubr.msk.bf16.gmra.mxu0 %vm468_vm1, %v2944_v18  ;;  %v2948_v9 = vsel %vm2543_vm3, %v2945_v27, %v6528_v61  ;;  %v7173_v57 = vld [vmem:[#allocation32_spill] sm:$0xff]  ;;  %v7176_v27 = vld [vmem:[#allocation17_spill] sm:$0xff] }
 0x1ae   : > { %v4849_v6 = vpop.f32.mrf.mxu1  ;;  %5048 = vmatmul.mubr.msk.bf16.gmra.mxu1 %vm468_vm1, %v7154_v23  ;;  %5101 = vmatprep.mubr.msk.bf16.mxu0 %vm468_vm1, %v2946_v58 }
 0x1af   : > { %v6530_v53 = vadd.f32 %v2098_v1, %v1889_v30  ;;  %v1894_v4 = vadd.f32 %v4849_v6, %v7168_v51  ;;  %v2111_v19 = vpop.f32.mrf.mxu0  ;;  %5051 = vmatprep.mubr.msk.bf16.mxu1 %vm468_vm1, %v7159_v28  ;;  %v3245_v28 = vsel %vm2543_vm3, %v6528_v61, %v3244_v26 }
 0x1b0   : > { %v1797_v8 = vpop.f32.mrf.mxu1 }
 0x1b1   : > { %7167 = vst [vmem:[#allocation26_spill] sm:$0xff] %v6530_v53  ;;  %v6536_v54 = vadd.f32 %v4899_v63, %v1894_v4  ;;  %v1892_v23 = vadd.f32 %v1797_v8, %v7171_v10  ;;  %v4900_v24 = vpop.f32.mrf.mxu0  ;;  %v7175_v63 = vld [vmem:[#allocation23_spill] sm:$0xff] }
 0x1b2   : > { %v4850_v37 = vpop.f32.mrf.mxu1  ;;  %v5249_v53 = vld [vmem:[%s5431_s13 + $0xf0] ss:$0 sps:$4 sm:$0x33]   ;;  %s5125_s13 = smul.u32 384, %s260_s10 }
 0x1b3   : > { %7170 = vst [vmem:[#allocation30_spill] sm:$0xff] %v6536_v54  ;;  %v6541_v1 = vadd.f32 %v2111_v19, %v1892_v23  ;;  %v1895_v30 = vadd.f32 %v4850_v37, %v7173_v57  ;;  %v2114_v6 = vpop.f32.mrf.mxu0  ;;  %v3246_v19 = vrot.slane %v7176_v27, 2  ;;  %v7178_v23 = vld [vmem:[#allocation29_spill] sm:$0xff]  ;;  %v7179_v57 = vld [vmem:[#allocation18_spill] sm:$0xff] }
 0x1b4   : > { %v1800_v40 = vpop.f32.mrf.mxu1  ;;  %s6774_s22 = scalar_lea.vmem [#allocation2], %s5125_s13 }
 0x1b5   : > { %7172 = vst [vmem:[#allocation38_spill] sm:$0xff] %v6541_v1  ;;  %v6546_v51 = vadd.f32 %v4900_v24, %v1895_v30  ;;  %v1893_v4 = vadd.f32 %v1800_v40, %v7175_v63  ;;  %v4903_v15 = vpop.f32.mrf.mxu0  ;;  %5102 = vmatmul.mubr.msk.bf16.gmra.mxu0 %vm468_vm1, %v2948_v9  ;;  %v3248_v30 = vrot.slane %v7179_v57, 2  ;;  %s4012_s26 = sshll.u32 %s6774_s22, 4  ;;  %s6963_s26 = int_to_ptr.vmem [resolvable:$true] %s4012_s26 }
 0x1b6   : > { %v4853_v8 = vpop.f32.mrf.mxu1  ;;  %5052 = vmatmul.mubr.msk.bf16.gmra.mxu1 %vm468_vm1, %v7160_v35  ;;  %5105 = vmatprep.mubr.msk.bf16.mxu0 %vm468_vm1, %v3245_v28  ;;  %v3247_v28 = vsel %vm2543_vm3, %v3244_v26, %v3246_v19  ;;  %v3250_v26 = vrot.slane %v5249_v53, 2  ;;  %s5251_s6 = scalar_lea.vmem %s6963_s26, 6144  ;;  %p5258_p1 = scmp.lt.s32.totalorder %s6963_s26, %s5256_s8 }
 0x1b7   : > { %7174 = vst [vmem:[#allocation14_spill] sm:$0xff] %v6546_v51  ;;  %v6554_v10 = vadd.f32 %v2114_v6, %v1893_v4  ;;  %v1898_v37 = vadd.f32 %v4853_v8, %v7178_v23  ;;  %v2127_v24 = vpop.f32.mrf.mxu0  ;;  %5055 = vmatprep.mubr.msk.bf16.mxu1 %vm468_vm1, %v2944_v18  ;;  %v7180_v51 = vld [vmem:[#allocation24_spill] sm:$0xff]  ;;  %v7181_v6 = vld [vmem:[#allocation13_spill] sm:$0xff]  ;;  %v3249_v23 = vsel %vm2543_vm3, %v3246_v19, %v3248_v30  ;;  %p5252_p12 = scmp.ne.s32.totalorder %s6963_s26, %s5251_s6  ;;  %p5259_p2 = scmp.lt.s32.totalorder %s5257_s9, %s5251_s6 }
 0x1b8   : > { %v1813_v40 = vpop.f32.mrf.mxu1 }
 0x1b9   : > { %7177 = vst [vmem:[#allocation31_spill] sm:$0xff] %v6554_v10  ;;  %v6559_v63 = vadd.f32 %v4903_v15, %v1898_v37  ;;  %v1896_v1 = vadd.f32 %v1813_v40, %v7180_v51  ;;  %v4904_v54 = vpop.f32.mrf.mxu0  ;;  %p5253_p13 = pnand %p5252_p12, %p5397_p4  ;;  %p5260_p3 = por %p5259_p2, %p5258_p1 }
 0x1ba   : > { %v4854_v35 = vpop.f32.mrf.mxu1 }
 0x1bb   : > { %v6564_v27 = vadd.f32 %v2127_v24, %v1896_v1  ;;  %v1899_v4 = vadd.f32 %v4854_v35, %v7181_v6  ;;  %v2130_v8 = vpop.f32.mrf.mxu0  ;;  %p5254_p0 = pneg %p5253_p13 }
 0x1bc   : > { %v1816_v18 = vpop.f32.mrf.mxu1 }
 0x1bd   : > { %v6568_v10 = vadd.f32 %v4904_v54, %v1899_v4  ;;  %v1897_v15 = vadd.f32 %v1816_v18, %v6324_v42  ;;  %v4907_v37 = vpop.f32.mrf.mxu0  ;;  %5106 = vmatmul.mubr.msk.bf16.gmra.mxu0 %vm468_vm1, %v3247_v28  ;;  %v7182_v54 = vld [vmem:[#allocation36_spill] sm:$0xff]  ;;  %v7183_v18 = vld [vmem:[#allocation25_spill] sm:$0xff]  ;;  %p5261_p5 = pnand %p5260_p3, %p5254_p0 }
 0x1be   : > { %v4857_v51 = vpop.f32.mrf.mxu1  ;;  %5056 = vmatmul.mubr.msk.bf16.gmra.mxu1 %vm468_vm1, %v2946_v58  ;;  %5109 = vmatprep.mubr.msk.bf16.mxu0 %vm468_vm1, %v3249_v23  ;;  %v2949_v19 = vrot.slane %v7182_v54, 2  ;;  %v3251_v58 = vsel %vm2543_vm3, %v3248_v30, %v3250_v26 }
 0x1bf   : > { %v6574_v1 = vadd.f32 %v2130_v8, %v1897_v15  ;;  %v1902_v24 = vadd.f32 %v4857_v51, %v6328_v7  ;;  %v2143_v57 = vpop.f32.mrf.mxu0  ;;  %5059 = vmatprep.mubr.msk.bf16.mxu1 %vm468_vm1, %v2948_v9 }
 0x1c0   : > { %v1829_v40 = vpop.f32.mrf.mxu1  ;;  %v2950_v7 = vsel %vm2543_vm3, %v6528_v61, %v2949_v19 }
 0x1c1   : > { %v6579_v42 = vadd.f32 %v4907_v37, %v1902_v24  ;;  %v1900_v35 = vadd.f32 %v1829_v40, %v6333_v20  ;;  %v4908_v28 = vpop.f32.mrf.mxu0 }
 0x1c2   : > { %v4858_v6 = vpop.f32.mrf.mxu1 }
 0x1c3   : > { %v6583_v4 = vadd.f32 %v2143_v57, %v1900_v35  ;;  %v1903_v53 = vadd.f32 %v4858_v6, %v6337_v2  ;;  %v2146_v8 = vpop.f32.mrf.mxu0 }
 0x1c4   : > { %v1832_v9 = vpop.f32.mrf.mxu1 }
 0x1c5   : > { %v6588_v23 = vadd.f32 %v4908_v28, %v1903_v53  ;;  %v1901_v15 = vadd.f32 %v1832_v9, %v7183_v18  ;;  %v4911_v37 = vpop.f32.mrf.mxu0  ;;  %5110 = vmatmul.mubr.msk.bf16.gmra.mxu0 %vm468_vm1, %v3251_v58 }
 0x1c6   : > { %v4861_v20 = vpop.f32.mrf.mxu1  ;;  %5060 = vmatmul.mubr.msk.bf16.gmra.mxu1 %vm468_vm1, %v2950_v7 }
 0x1c7   : > { %v6593_v30 = vadd.f32 %v2146_v8, %v1901_v15  ;;  %v1906_v51 = vadd.f32 %v4861_v20, %v6349_v62  ;;  %v2159_v2 = vpop.f32.mrf.mxu0 }
 0x1c8   : > { %v1845_v26 = vpop.f32.mrf.mxu1 }
 0x1c9   : > { %v6596_v24 = vadd.f32 %v4911_v37, %v1906_v51  ;;  %v1904_v61 = vadd.f32 %v1845_v26, %v6352_v38  ;;  %v4912_v57 = vpop.f32.mrf.mxu0 }
 0x1ca   : > { %v4862_v54 = vpop.f32.mrf.mxu1 }
 0x1cb   : > { %v6599_v19 = vadd.f32 %v2159_v2, %v1904_v61  ;;  %v1907_v40 = vadd.f32 %v4862_v54, %v6355_v3  ;;  %v2162_v35 = vpop.f32.mrf.mxu0 }
 0x1cc   : > { %v1848_v28 = vpop.f32.mrf.mxu1 }
 0x1cd   : > { %v6602_v6 = vadd.f32 %v4912_v57, %v1907_v40  ;;  %v1905_v58 = vadd.f32 %v1848_v28, %v6364_v13  ;;  %v4967_v53 = vpop.f32.mrf.mxu0 }
 0x1ce   : > { %v4917_v62 = vpop.f32.mrf.mxu1 }
 0x1cf   : > { %v6605_v8 = vadd.f32 %v2162_v35, %v1905_v58  ;;  %v2490_v7 = vadd.f32 %v4917_v62, %v6369_v32  ;;  %v2702_v9 = vpop.f32.mrf.mxu0 }
 0x1d0   : > { %v2297_v38 = vpop.f32.mrf.mxu1 }
 0x1d1   : > { %v6608_v18 = vadd.f32 %v4967_v53, %v2490_v7  ;;  %v2488_v15 = vadd.f32 %v2297_v38, %v6372_v47  ;;  %v4968_v37 = vpop.f32.mrf.mxu0 }
 0x1d2   : > { %v4918_v3 = vpop.f32.mrf.mxu1 }
 0x1d3   : > { %v6611_v20 = vadd.f32 %v2702_v9, %v2488_v15  ;;  %v2491_v51 = vadd.f32 %v4918_v3, %v6375_v33  ;;  %v2705_v2 = vpop.f32.mrf.mxu0 }
 0x1d4   : > { %v2300_v13 = vpop.f32.mrf.mxu1 }
 0x1d5   : > { %v6614_v26 = vadd.f32 %v4968_v37, %v2491_v51  ;;  %v2489_v61 = vadd.f32 %v2300_v13, %v6384_v45  ;;  %v4971_v57 = vpop.f32.mrf.mxu0 }
 0x1d6   : > { %v4921_v32 = vpop.f32.mrf.mxu1 }
 0x1d7   : > { %v6617_v54 = vadd.f32 %v2705_v2, %v2489_v61  ;;  %v2494_v40 = vadd.f32 %v4921_v32, %v6389_v55  ;;  %v2718_v35 = vpop.f32.mrf.mxu0 }
 0x1d8   : > { %v2313_v47 = vpop.f32.mrf.mxu1 }
 0x1d9   : > { %v6620_v28 = vadd.f32 %v4971_v57, %v2494_v40  ;;  %v2492_v58 = vadd.f32 %v2313_v47, %v6392_v41  ;;  %v4972_v53 = vpop.f32.mrf.mxu0 }
 0x1da   : > { %v4922_v33 = vpop.f32.mrf.mxu1 }
 0x1db   : > { %v6623_v62 = vadd.f32 %v2718_v35, %v2492_v58  ;;  %v2495_v7 = vadd.f32 %v4922_v33, %v6395_v36  ;;  %v2721_v9 = vpop.f32.mrf.mxu0 }
 0x1dc   : > { %v2316_v45 = vpop.f32.mrf.mxu1 }
 0x1dd   : > { %v6626_v38 = vadd.f32 %v4972_v53, %v2495_v7  ;;  %v2493_v15 = vadd.f32 %v2316_v45, %v6404_v56  ;;  %v4975_v37 = vpop.f32.mrf.mxu0 }
 0x1de   : > { %v4925_v55 = vpop.f32.mrf.mxu1 }
 0x1df   : > { %v6629_v3 = vadd.f32 %v2721_v9, %v2493_v15  ;;  %v2498_v51 = vadd.f32 %v4925_v55, %v6409_v34  ;;  %v2734_v2 = vpop.f32.mrf.mxu0 }
 0x1e0   : > { %v2329_v41 = vpop.f32.mrf.mxu1 }
 0x1e1   : > { %v6632_v13 = vadd.f32 %v4975_v37, %v2498_v51  ;;  %v2496_v61 = vadd.f32 %v2329_v41, %v6412_v39  ;;  %v4976_v57 = vpop.f32.mrf.mxu0 }
 0x1e2   : > { %v4926_v36 = vpop.f32.mrf.mxu1 }
 0x1e3   : > { %v6635_v32 = vadd.f32 %v2734_v2, %v2496_v61  ;;  %v2499_v40 = vadd.f32 %v4926_v36, %v6415_v44  ;;  %v2737_v35 = vpop.f32.mrf.mxu0 }
 0x1e4   : > { %v2332_v56 = vpop.f32.mrf.mxu1 }
 0x1e5   : > { %v6638_v47 = vadd.f32 %v4976_v57, %v2499_v40  ;;  %v2497_v58 = vadd.f32 %v2332_v56, %v6424_v0  ;;  %v4979_v53 = vpop.f32.mrf.mxu0 }
 0x1e6   : > { %v4929_v34 = vpop.f32.mrf.mxu1 }
 0x1e7   : > { %v6641_v33 = vadd.f32 %v2737_v35, %v2497_v58  ;;  %v2502_v7 = vadd.f32 %v4929_v34, %v6429_v43  ;;  %v2750_v9 = vpop.f32.mrf.mxu0 }
 0x1e8   : > { %v2345_v39 = vpop.f32.mrf.mxu1 }
 0x1e9   : > { %v6644_v45 = vadd.f32 %v4979_v53, %v2502_v7  ;;  %v2500_v15 = vadd.f32 %v2345_v39, %v6432_v14  ;;  %v4980_v37 = vpop.f32.mrf.mxu0 }
 0x1ea   : > { %v4930_v44 = vpop.f32.mrf.mxu1 }
 0x1eb   : > { %v6647_v55 = vadd.f32 %v2750_v9, %v2500_v15  ;;  %v2503_v51 = vadd.f32 %v4930_v44, %v6435_v60  ;;  %v2753_v2 = vpop.f32.mrf.mxu0 }
 0x1ec   : > { %v2348_v0 = vpop.f32.mrf.mxu1 }
 0x1ed   : > { %v6650_v41 = vadd.f32 %v4980_v37, %v2503_v51  ;;  %v2501_v61 = vadd.f32 %v2348_v0, %v6444_v11  ;;  %v4983_v57 = vpop.f32.mrf.mxu0 }
 0x1ee   : > { %v4933_v43 = vpop.f32.mrf.mxu1 }
 0x1ef   : > { %v6653_v36 = vadd.f32 %v2753_v2, %v2501_v61  ;;  %v2506_v40 = vadd.f32 %v4933_v43, %v6449_v25  ;;  %v2766_v35 = vpop.f32.mrf.mxu0 }
 0x1f0   : > { %v2361_v14 = vpop.f32.mrf.mxu1 }
 0x1f1   : > { %v6656_v56 = vadd.f32 %v4983_v57, %v2506_v40  ;;  %v2504_v58 = vadd.f32 %v2361_v14, %v6452_v50  ;;  %v4984_v53 = vpop.f32.mrf.mxu0 }
 0x1f2   : > { %v4934_v60 = vpop.f32.mrf.mxu1 }
 0x1f3   : > { %v6659_v34 = vadd.f32 %v2766_v35, %v2504_v58  ;;  %v2507_v7 = vadd.f32 %v4934_v60, %v6455_v49  ;;  %v2769_v9 = vpop.f32.mrf.mxu0 }
 0x1f4   : > { %v2364_v11 = vpop.f32.mrf.mxu1 }
 0x1f5   : > { %v6662_v39 = vadd.f32 %v4984_v53, %v2507_v7  ;;  %v2505_v15 = vadd.f32 %v2364_v11, %v6464_v17  ;;  %v4987_v37 = vpop.f32.mrf.mxu0 }
 0x1f6   : > { %v4937_v25 = vpop.f32.mrf.mxu1 }
 0x1f7   : > { %v6665_v44 = vadd.f32 %v2769_v9, %v2505_v15  ;;  %v2510_v51 = vadd.f32 %v4937_v25, %v6469_v59  ;;  %v2782_v2 = vpop.f32.mrf.mxu0 }
 0x1f8   : > { %v2377_v50 = vpop.f32.mrf.mxu1 }
 0x1f9   : > { %v6668_v0 = vadd.f32 %v4987_v37, %v2510_v51  ;;  %v2508_v61 = vadd.f32 %v2377_v50, %v6472_v22  ;;  %v4988_v57 = vpop.f32.mrf.mxu0 }
 0x1fa   : > { %v4938_v49 = vpop.f32.mrf.mxu1 }
 0x1fb   : > { %v6671_v43 = vadd.f32 %v2782_v2, %v2508_v61  ;;  %v2511_v40 = vadd.f32 %v4938_v49, %v6475_v5  ;;  %v2785_v35 = vpop.f32.mrf.mxu0 }
 0x1fc   : > { %v2380_v17 = vpop.f32.mrf.mxu1 }
 0x1fd   : > { %v6674_v14 = vadd.f32 %v4988_v57, %v2511_v40  ;;  %v2509_v58 = vadd.f32 %v2380_v17, %v6484_v48  ;;  %v4991_v53 = vpop.f32.mrf.mxu0 }
 0x1fe   : > { %v4941_v59 = vpop.f32.mrf.mxu1 }
 0x1ff   : > { %v6677_v60 = vadd.f32 %v2785_v35, %v2509_v58  ;;  %v2514_v7 = vadd.f32 %v4941_v59, %v6489_v31  ;;  %v2798_v9 = vpop.f32.mrf.mxu0 }
 0x200   : > { %v2393_v22 = vpop.f32.mrf.mxu1 }
 0x201   : > { %v6680_v11 = vadd.f32 %v4991_v53, %v2514_v7  ;;  %v2512_v15 = vadd.f32 %v2393_v22, %v6492_v12  ;;  %v4992_v37 = vpop.f32.mrf.mxu0 }
 0x202   : > { %v4942_v5 = vpop.f32.mrf.mxu1 }
 0x203   : > { %v6683_v25 = vadd.f32 %v2798_v9, %v2512_v15  ;;  %v2515_v51 = vadd.f32 %v4942_v5, %v6495_v29  ;;  %v2801_v2 = vpop.f32.mrf.mxu0  ;;  %v7184_v15 = vld [vmem:[#allocation26_spill] sm:$0xff] }
 0x204   : > { %v2396_v48 = vpop.f32.mrf.mxu1 }
 0x205   : > { %v6686_v50 = vadd.f32 %v4992_v37, %v2515_v51  ;;  %v2513_v61 = vadd.f32 %v2396_v48, %v6505_v16  ;;  %v4995_v57 = vpop.f32.mrf.mxu0 }
 0x206   : > { %v4945_v31 = vpop.f32.mrf.mxu1 }
 0x207   : > { %v6689_v49 = vadd.f32 %v2801_v2, %v2513_v61  ;;  %v2518_v40 = vadd.f32 %v4945_v31, %v6511_v46  ;;  %v2814_v35 = vpop.f32.mrf.mxu0  ;;  %v7185_v2 = vld [vmem:[#allocation30_spill] sm:$0xff] }
 0x208   : > { %v2409_v12 = vpop.f32.mrf.mxu1  ;;  %v7186_v31 = vld [vmem:[#allocation38_spill] sm:$0xff] }
 0x209   : > { %v6692_v17 = vadd.f32 %v4995_v57, %v2518_v40  ;;  %v2516_v58 = vadd.f32 %v2409_v12, %v6516_v52  ;;  %v4996_v53 = vpop.f32.mrf.mxu0 }
 0x20a   : > { %v4946_v29 = vpop.f32.mrf.mxu1 }
 0x20b   : > { %v6695_v59 = vadd.f32 %v2814_v35, %v2516_v58  ;;  %v2519_v7 = vadd.f32 %v4946_v29, %v6520_v21  ;;  %v2817_v9 = vpop.f32.mrf.mxu0  ;;  %v7187_v58 = vld [vmem:[#allocation14_spill] sm:$0xff] }
 0x20c   : > { %v2412_v16 = vpop.f32.mrf.mxu1 }
 0x20d   : > { %v6698_v22 = vadd.f32 %v4996_v53, %v2519_v7  ;;  %v2517_v37 = vadd.f32 %v2412_v16, %v7184_v15  ;;  %v4999_v5 = vpop.f32.mrf.mxu0 }
 0x20e   : > { %v4949_v46 = vpop.f32.mrf.mxu1 }
 0x20f   : > { %v6701_v51 = vadd.f32 %v2817_v9, %v2517_v37  ;;  %v2522_v48 = vadd.f32 %v4949_v46, %v7185_v2  ;;  %v2830_v61 = vpop.f32.mrf.mxu0  ;;  %v7188_v9 = vld [vmem:[#allocation31_spill] sm:$0xff] }
 0x210   : > { %v2425_v52 = vpop.f32.mrf.mxu1 }
 0x211   : > { %v6704_v57 = vadd.f32 %v4999_v5, %v2522_v48  ;;  %v2520_v40 = vadd.f32 %v2425_v52, %v7186_v31  ;;  %v5000_v35 = vpop.f32.mrf.mxu0 }
 0x212   : > { %v4950_v21 = vpop.f32.mrf.mxu1 }
 0x213   : > { %v6707_v12 = vadd.f32 %v2830_v61, %v2520_v40  ;;  %v2523_v53 = vadd.f32 %v4950_v21, %v7187_v58  ;;  %v2833_v29 = vpop.f32.mrf.mxu0 }
 0x214   : > { %v2428_v7 = vpop.f32.mrf.mxu1 }
 0x215   : > { %v6710_v16 = vadd.f32 %v5000_v35, %v2523_v53  ;;  %v2521_v15 = vadd.f32 %v2428_v7, %v7188_v9  ;;  %v5003_v37 = vpop.f32.mrf.mxu0 }
 0x216   : > { %v4953_v46 = vpop.f32.mrf.mxu1 }
 0x217   : > { %v6713_v2 = vadd.f32 %v2833_v29, %v2521_v15  ;;  %v2526_v5 = vadd.f32 %v4953_v46, %v6559_v63  ;;  %v2846_v48 = vpop.f32.mrf.mxu0 }
 0x218   : > { %v2441_v52 = vpop.f32.mrf.mxu1 }
 0x219   : > { %v6716_v31 = vadd.f32 %v5003_v37, %v2526_v5  ;;  %v2524_v61 = vadd.f32 %v2441_v52, %v6564_v27  ;;  %v5004_v40 = vpop.f32.mrf.mxu0 }
 0x21a   : > { %v4954_v21 = vpop.f32.mrf.mxu1 }
 0x21b   : > { %v6719_v58 = vadd.f32 %v2846_v48, %v2524_v61  ;;  %v2527_v35 = vadd.f32 %v4954_v21, %v6568_v10  ;;  %v2849_v53 = vpop.f32.mrf.mxu0 }
 0x21c   : > { %v2444_v7 = vpop.f32.mrf.mxu1 }
 0x21d   : > { %v6722_v9 = vadd.f32 %v5004_v40, %v2527_v35  ;;  %v2525_v29 = vadd.f32 %v2444_v7, %v6574_v1  ;;  %v5007_v15 = vpop.f32.mrf.mxu0 }
 0x21e   : > { %v4957_v63 = vpop.f32.mrf.mxu1 }
 0x21f   : > { %v6725_v46 = vadd.f32 %v2849_v53, %v2525_v29  ;;  %v2530_v37 = vadd.f32 %v4957_v63, %v6579_v42  ;;  %v2862_v5 = vpop.f32.mrf.mxu0 }
 0x220   : > { %v2457_v27 = vpop.f32.mrf.mxu1 }
 0x221   : > { %v6728_v52 = vadd.f32 %v5007_v15, %v2530_v37  ;;  %v2528_v48 = vadd.f32 %v2457_v27, %v6583_v4  ;;  %v5008_v61 = vpop.f32.mrf.mxu0 }
 0x222   : > { %v4958_v10 = vpop.f32.mrf.mxu1 }
 0x223   : > { %v6731_v21 = vadd.f32 %v2862_v5, %v2528_v48  ;;  %v2531_v40 = vadd.f32 %v4958_v10, %v6588_v23  ;;  %v2865_v35 = vpop.f32.mrf.mxu0 }
 0x224   : > { %v2460_v1 = vpop.f32.mrf.mxu1 }
 0x225   : > { %v6734_v7 = vadd.f32 %v5008_v61, %v2531_v40  ;;  %v2529_v53 = vadd.f32 %v2460_v1, %v6593_v30  ;;  %v5011_v29 = vpop.f32.mrf.mxu0 }
 0x226   : > { %v4961_v42 = vpop.f32.mrf.mxu1 }
 0x227   : > { %v6737_v63 = vadd.f32 %v2865_v35, %v2529_v53  ;;  %v2534_v15 = vadd.f32 %v4961_v42, %v6596_v24  ;;  %v2878_v37 = vpop.f32.mrf.mxu0 }
 0x228   : > { %v2473_v4 = vpop.f32.mrf.mxu1 }
 0x229   : > { %v6740_v27 = vadd.f32 %v5011_v29, %v2534_v15  ;;  %v2532_v5 = vadd.f32 %v2473_v4, %v6599_v19  ;;  %v5012_v23 = vpop.f32.mrf.mxu0  ;;  %v6756_v15 = vld [vmem:[%s7016_s2] ss:$0 sm:$0xff] }
 0x22a   : > { %v4962_v48 = vpop.f32.mrf.mxu1 }
 0x22b   : > { %v6743_v10 = vadd.f32 %v2878_v37, %v2532_v5  ;;  %v2535_v61 = vadd.f32 %v4962_v48, %v6602_v6  ;;  %v2881_v30 = vpop.f32.mrf.mxu0 }
 0x22c   : > { %v2476_v40 = vpop.f32.mrf.mxu1 }
 0x22d   : > { %7189 = vst [vmem:[#allocation20_spill] sm:$0xff] %v6743_v10  ;;  %v6746_v35 = vadd.f32 %v5012_v23, %v2535_v61  ;;  %v2533_v24 = vadd.f32 %v2476_v40, %v6605_v8  ;;  %v5067_v1 = vpop.f32.mrf.mxu0  ;;  %v6764_v8 = vld [vmem:[%s7017_s3] ss:$0 sm:$0xff] }
 0x22e   : > { %v5017_v53 = vpop.f32.mrf.mxu1 }
 0x22f   : > { %7190 = vst [vmem:[#allocation33_spill] sm:$0xff] %v6746_v35  ;;  %v6749_v42 = vadd.f32 %v2881_v30, %v2533_v24  ;;  %v3193_v29 = vadd.f32 %v5017_v53, %v6608_v18  ;;  %v3301_v19 = vpop.f32.mrf.mxu0 }
 0x230   : > { %v3000_v6 = vpop.f32.mrf.mxu1 }
 0x231   : > { %7191 = vst [vmem:[#allocation34_spill] sm:$0xff] %v6749_v42  ;;  %v3494_v37 = vadd.f32 %v5067_v1, %v3193_v29  ;;  %v3191_v4 = vadd.f32 %v3000_v6, %v6611_v20  ;;  %v5068_v5 = vpop.f32.mrf.mxu0 }
 0x232   : > { %v5018_v18 = vpop.f32.mrf.mxu1 }
 0x233   : > { %v3800_v23 = vmul.f32 %v6756_v15, %v3494_v37  ;;  %v3492_v48 = vadd.f32 %v3301_v19, %v3191_v4  ;;  %v3194_v61 = vadd.f32 %v5018_v18, %v6614_v26  ;;  %v3304_v30 = vpop.f32.mrf.mxu0 }
 0x234   : > { %v3003_v40 = vpop.f32.mrf.mxu1 }
 0x235   : > { %v3855_v24 = vadd.f32 %v6764_v8, %v3800_v23  ;;  %v3798_v20 = vmul.f32 %v6756_v15, %v3492_v48  ;;  %v3495_v1 = vadd.f32 %v5068_v5, %v3194_v61  ;;  %v3192_v53 = vadd.f32 %v3003_v40, %v6617_v54  ;;  %v5071_v29 = vpop.f32.mrf.mxu0 }
 0x236   : > { %v5021_v6 = vpop.f32.mrf.mxu1 }
 0x237   : > { %v3903_v42 = vmax.f32 %v3855_v24, 0.0  ;;  %v3853_v35 = vadd.f32 %v6764_v8, %v3798_v20  ;;  %v3801_v10 = vmul.f32 %v6756_v15, %v3495_v1  ;;  %v3493_v37 = vadd.f32 %v3304_v30, %v3192_v53  ;;  %v3317_v19 = vpop.f32.mrf.mxu0 }
 0x238   : > { %v3197_v26 = vadd.f32 %v5021_v6, %v6620_v28  ;;  %v3016_v4 = vpop.f32.mrf.mxu1 }
 0x239   : > { %3951 = vst [vmem:[%s6774_s22 + $0x10] sm:$0xff] %v3903_v42  ;;  %v3901_v5 = vmax.f32 %v3853_v35, 0.0  ;;  %v3856_v54 = vadd.f32 %v6764_v8, %v3801_v10  ;;  %v3799_v18 = vmul.f32 %v6756_v15, %v3493_v37  ;;  %v3195_v23 = vadd.f32 %v3016_v4, %v6623_v62  ;;  %v5072_v48 = vpop.f32.mrf.mxu0 }
 0x23a   : > { %v3498_v61 = vadd.f32 %v5071_v29, %v3197_v26  ;;  %v5022_v30 = vpop.f32.mrf.mxu1 }
 0x23b   : > { %3949 = vst [vmem:[%s6774_s22] sm:$0xff] %v3901_v5  ;;  %v3904_v28 = vmax.f32 %v3856_v54, 0.0  ;;  %v3854_v40 = vadd.f32 %v6764_v8, %v3799_v18  ;;  %v3496_v24 = vadd.f32 %v3317_v19, %v3195_v23  ;;  %v3198_v20 = vadd.f32 %v5022_v30, %v6626_v38  ;;  %v3320_v42 = vpop.f32.mrf.mxu0 }
 0x23c   : > { %v3804_v35 = vmul.f32 %v6756_v15, %v3498_v61  ;;  %v3019_v1 = vpop.f32.mrf.mxu1 }
 0x23d   : > { %3952 = vst [vmem:[%s6774_s22 + $0x18] sm:$0xff] %v3904_v28  ;;  %v3902_v10 = vmax.f32 %v3854_v40, 0.0  ;;  %v3802_v53 = vmul.f32 %v6756_v15, %v3496_v24  ;;  %v3499_v62 = vadd.f32 %v5072_v48, %v3198_v20  ;;  %v3196_v29 = vadd.f32 %v3019_v1, %v6629_v3  ;;  %v5075_v6 = vpop.f32.mrf.mxu0 }
 0x23e   : > { %v3859_v37 = vadd.f32 %v6764_v8, %v3804_v35  ;;  %v5025_v26 = vpop.f32.mrf.mxu1 }
 0x23f   : > { %3950 = vst [vmem:[%s6774_s22 + $0x8] sm:$0xff] %v3902_v10  ;;  %v3857_v38 = vadd.f32 %v6764_v8, %v3802_v53  ;;  %v3805_v19 = vmul.f32 %v6756_v15, %v3499_v62  ;;  %v3497_v4 = vadd.f32 %v3320_v42, %v3196_v29  ;;  %v3201_v5 = vadd.f32 %v5025_v26, %v6632_v13  ;;  %v3333_v54 = vpop.f32.mrf.mxu0 }
 0x240   : > { %v3907_v18 = vmax.f32 %v3859_v37, 0.0  ;;  %v3032_v23 = vpop.f32.mrf.mxu1 }
 0x241   : > { %v3905_v48 = vmax.f32 %v3857_v38, 0.0  ;;  %v3860_v3 = vadd.f32 %v6764_v8, %v3805_v19  ;;  %v3803_v61 = vmul.f32 %v6756_v15, %v3497_v4  ;;  %v3502_v30 = vadd.f32 %v5075_v6, %v3201_v5  ;;  %v5076_v28 = vpop.f32.mrf.mxu0 }
 0x242   : > { %3955 = vst [vmem:[%s6774_s22 + $0x30] sm:$0xff] %v3907_v18  ;;  %v3199_v40 = vadd.f32 %v3032_v23, %v6635_v32  ;;  %v5026_v24 = vpop.f32.mrf.mxu1 }
 0x243   : > { %3953 = vst [vmem:[%s6774_s22 + $0x20] sm:$0xff] %v3905_v48  ;;  %v3908_v20 = vmax.f32 %v3860_v3, 0.0  ;;  %v3858_v13 = vadd.f32 %v6764_v8, %v3803_v61  ;;  %v3808_v42 = vmul.f32 %v6756_v15, %v3502_v30  ;;  %v3202_v35 = vadd.f32 %v5026_v24, %v6638_v47  ;;  %v3336_v1 = vpop.f32.mrf.mxu0 }
 0x244   : > { %v3500_v10 = vadd.f32 %v3333_v54, %v3199_v40  ;;  %v3035_v53 = vpop.f32.mrf.mxu1 }
 0x245   : > { %3956 = vst [vmem:[%s6774_s22 + $0x38] sm:$0xff] %v3908_v20  ;;  %v3906_v62 = vmax.f32 %v3858_v13, 0.0  ;;  %v3863_v29 = vadd.f32 %v6764_v8, %v3808_v42  ;;  %v3503_v6 = vadd.f32 %v5076_v28, %v3202_v35  ;;  %v3200_v32 = vadd.f32 %v3035_v53, %v6641_v33  ;;  %v5079_v37 = vpop.f32.mrf.mxu0 }
 0x246   : > { %v3806_v26 = vmul.f32 %v6756_v15, %v3500_v10  ;;  %v5029_v38 = vpop.f32.mrf.mxu1 }
 0x247   : > { %3954 = vst [vmem:[%s6774_s22 + $0x28] sm:$0xff] %v3906_v62  ;;  %v3911_v19 = vmax.f32 %v3863_v29, 0.0  ;;  %v3809_v4 = vmul.f32 %v6756_v15, %v3503_v6  ;;  %v3501_v47 = vadd.f32 %v3336_v1, %v3200_v32  ;;  %v3205_v5 = vadd.f32 %v5029_v38, %v6644_v45  ;;  %v3349_v54 = vpop.f32.mrf.mxu0 }
 0x248   : > { %v3861_v18 = vadd.f32 %v6764_v8, %v3806_v26  ;;  %v3048_v23 = vpop.f32.mrf.mxu1 }
 0x249   : > { %3959 = vst [vmem:[%s6774_s22 + $0x50] sm:$0xff] %v3911_v19  ;;  %v3864_v33 = vadd.f32 %v6764_v8, %v3809_v4  ;;  %v3807_v48 = vmul.f32 %v6756_v15, %v3501_v47  ;;  %v3506_v3 = vadd.f32 %v5079_v37, %v3205_v5  ;;  %v3203_v61 = vadd.f32 %v3048_v23, %v6647_v55  ;;  %v5080_v30 = vpop.f32.mrf.mxu0 }
 0x24a   : > { %v3909_v28 = vmax.f32 %v3861_v18, 0.0  ;;  %v5030_v40 = vpop.f32.mrf.mxu1 }
 0x24b   : > { %v3912_v24 = vmax.f32 %v3864_v33, 0.0  ;;  %v3862_v45 = vadd.f32 %v6764_v8, %v3807_v48  ;;  %v3812_v20 = vmul.f32 %v6756_v15, %v3506_v3  ;;  %v3504_v13 = vadd.f32 %v3349_v54, %v3203_v61  ;;  %v3352_v42 = vpop.f32.mrf.mxu0 }
 0x24c   : > { %3957 = vst [vmem:[%s6774_s22 + $0x40] sm:$0xff] %v3909_v28  ;;  %v3206_v35 = vadd.f32 %v5030_v40, %v6650_v41  ;;  %v3051_v1 = vpop.f32.mrf.mxu1 }
 0x24d   : > { %3960 = vst [vmem:[%s6774_s22 + $0x58] sm:$0xff] %v3912_v24  ;;  %v3910_v10 = vmax.f32 %v3862_v45, 0.0  ;;  %v3867_v55 = vadd.f32 %v6764_v8, %v3812_v20  ;;  %v3810_v53 = vmul.f32 %v6756_v15, %v3504_v13  ;;  %v3204_v62 = vadd.f32 %v3051_v1, %v6653_v36  ;;  %v5083_v29 = vpop.f32.mrf.mxu0 }
 0x24e   : > { %v3507_v6 = vadd.f32 %v5080_v30, %v3206_v35  ;;  %v5033_v32 = vpop.f32.mrf.mxu1 }
 0x24f   : > { %3958 = vst [vmem:[%s6774_s22 + $0x48] sm:$0xff] %v3910_v10  ;;  %v3915_v37 = vmax.f32 %v3867_v55, 0.0  ;;  %v3865_v26 = vadd.f32 %v6764_v8, %v3810_v53  ;;  %v3505_v38 = vadd.f32 %v3352_v42, %v3204_v62  ;;  %v3209_v41 = vadd.f32 %v5033_v32, %v6656_v56  ;;  %v3365_v19 = vpop.f32.mrf.mxu0 }
 0x250   : > { %v3813_v4 = vmul.f32 %v6756_v15, %v3507_v6  ;;  %v3064_v47 = vpop.f32.mrf.mxu1 }
 0x251   : > { %3963 = vst [vmem:[%s6774_s22 + $0x70] sm:$0xff] %v3915_v37  ;;  %v3913_v5 = vmax.f32 %v3865_v26, 0.0  ;;  %v3811_v54 = vmul.f32 %v6756_v15, %v3505_v38  ;;  %v3510_v36 = vadd.f32 %v5083_v29, %v3209_v41  ;;  %v3207_v18 = vadd.f32 %v3064_v47, %v6659_v34  ;;  %v5084_v23 = vpop.f32.mrf.mxu0 }
 0x252   : > { %v3868_v33 = vadd.f32 %v6764_v8, %v3813_v4  ;;  %v5034_v48 = vpop.f32.mrf.mxu1 }
 0x253   : > { %3961 = vst [vmem:[%s6774_s22 + $0x60] sm:$0xff] %v3913_v5  ;;  %v3866_v56 = vadd.f32 %v6764_v8, %v3811_v54  ;;  %v3816_v3 = vmul.f32 %v6756_v15, %v3510_v36  ;;  %v3508_v61 = vadd.f32 %v3365_v19, %v3207_v18  ;;  %v3210_v30 = vadd.f32 %v5034_v48, %v6662_v39  ;;  %v3368_v28 = vpop.f32.mrf.mxu0 }
 0x254   : > { %v3916_v40 = vmax.f32 %v3868_v33, 0.0  ;;  %v3067_v24 = vpop.f32.mrf.mxu1 }
 0x255   : > { %v3914_v45 = vmax.f32 %v3866_v56, 0.0  ;;  %v3871_v34 = vadd.f32 %v6764_v8, %v3816_v3  ;;  %v3814_v20 = vmul.f32 %v6756_v15, %v3508_v61  ;;  %v3511_v13 = vadd.f32 %v5084_v23, %v3210_v30  ;;  %v5087_v42 = vpop.f32.mrf.mxu0 }
 0x256   : > { %3964 = vst [vmem:[%s6774_s22 + $0x78] sm:$0xff] %v3916_v40  ;;  %v3208_v35 = vadd.f32 %v3067_v24, %v6665_v44  ;;  %v5037_v1 = vpop.f32.mrf.mxu1 }
 0x257   : > { %3962 = vst [vmem:[%s6774_s22 + $0x68] sm:$0xff] %v3914_v45  ;;  %v3919_v10 = vmax.f32 %v3871_v34, 0.0  ;;  %v3869_v39 = vadd.f32 %v6764_v8, %v3814_v20  ;;  %v3817_v55 = vmul.f32 %v6756_v15, %v3511_v13  ;;  %v3213_v53 = vadd.f32 %v5037_v1, %v6668_v0  ;;  %v3381_v62 = vpop.f32.mrf.mxu0 }
 0x258   : > { %v3509_v29 = vadd.f32 %v3368_v28, %v3208_v35  ;;  %v3080_v6 = vpop.f32.mrf.mxu1 }
 0x259   : > { %3967 = vst [vmem:[%s6774_s22 + $0x90] sm:$0xff] %v3919_v10  ;;  %v3917_v32 = vmax.f32 %v3869_v39, 0.0  ;;  %v3872_v37 = vadd.f32 %v6764_v8, %v3817_v55  ;;  %v3514_v26 = vadd.f32 %v5087_v42, %v3213_v53  ;;  %v3211_v44 = vadd.f32 %v3080_v6, %v6671_v43  ;;  %v5088_v38 = vpop.f32.mrf.mxu0 }
 0x25a   : > { %v3815_v41 = vmul.f32 %v6756_v15, %v3509_v29  ;;  %v5038_v19 = vpop.f32.mrf.mxu1 }
 0x25b   : > { %3965 = vst [vmem:[%s6774_s22 + $0x80] sm:$0xff] %v3917_v32  ;;  %v3920_v4 = vmax.f32 %v3872_v37, 0.0  ;;  %v3820_v47 = vmul.f32 %v6756_v15, %v3514_v26  ;;  %v3512_v0 = vadd.f32 %v3381_v62, %v3211_v44  ;;  %v3214_v5 = vadd.f32 %v5038_v19, %v6674_v14  ;;  %v3384_v54 = vpop.f32.mrf.mxu0 }
 0x25c   : > { %v3870_v36 = vadd.f32 %v6764_v8, %v3815_v41  ;;  %v3083_v18 = vpop.f32.mrf.mxu1 }
 0x25d   : > { %3968 = vst [vmem:[%s6774_s22 + $0x98] sm:$0xff] %v3920_v4  ;;  %v3875_v43 = vadd.f32 %v6764_v8, %v3820_v47  ;;  %v3818_v23 = vmul.f32 %v6756_v15, %v3512_v0  ;;  %v3515_v33 = vadd.f32 %v5088_v38, %v3214_v5  ;;  %v3212_v48 = vadd.f32 %v3083_v18, %v6677_v60  ;;  %v5091_v56 = vpop.f32.mrf.mxu0 }
 0x25e   : > { %v3918_v3 = vmax.f32 %v3870_v36, 0.0  ;;  %v5041_v61 = vpop.f32.mrf.mxu1 }
 0x25f   : > { %v3923_v30 = vmax.f32 %v3875_v43, 0.0  ;;  %v3873_v14 = vadd.f32 %v6764_v8, %v3818_v23  ;;  %v3821_v28 = vmul.f32 %v6756_v15, %v3515_v33  ;;  %v3513_v40 = vadd.f32 %v3384_v54, %v3212_v48  ;;  %v3397_v24 = vpop.f32.mrf.mxu0 }
 0x260   : > { %3966 = vst [vmem:[%s6774_s22 + $0x88] sm:$0xff] %v3918_v3  ;;  %v3217_v45 = vadd.f32 %v5041_v61, %v6680_v11  ;;  %v3096_v34 = vpop.f32.mrf.mxu1 }
 0x261   : > { %3971 = vst [vmem:[%s6774_s22 + $0xb0] sm:$0xff] %v3923_v30  ;;  %v3921_v20 = vmax.f32 %v3873_v14, 0.0  ;;  %v3876_v60 = vadd.f32 %v6764_v8, %v3821_v28  ;;  %v3819_v13 = vmul.f32 %v6756_v15, %v3513_v40  ;;  %v3215_v42 = vadd.f32 %v3096_v34, %v6683_v25  ;;  %v5092_v35 = vpop.f32.mrf.mxu0 }
 0x262   : > { %v3518_v1 = vadd.f32 %v5091_v56, %v3217_v45  ;;  %v5042_v10 = vpop.f32.mrf.mxu1 }
 0x263   : > { %3969 = vst [vmem:[%s6774_s22 + $0xa0] sm:$0xff] %v3921_v20  ;;  %v3924_v39 = vmax.f32 %v3876_v60, 0.0  ;;  %v3874_v55 = vadd.f32 %v6764_v8, %v3819_v13  ;;  %v3516_v53 = vadd.f32 %v3397_v24, %v3215_v42  ;;  %v3218_v11 = vadd.f32 %v5042_v10, %v6686_v50  ;;  %v3400_v62 = vpop.f32.mrf.mxu0 }
 0x264   : > { %v3824_v29 = vmul.f32 %v6756_v15, %v3518_v1  ;;  %v3099_v6 = vpop.f32.mrf.mxu1 }
 0x265   : > { %3972 = vst [vmem:[%s6774_s22 + $0xb8] sm:$0xff] %v3924_v39  ;;  %v3922_v32 = vmax.f32 %v3874_v55, 0.0  ;;  %v3822_v37 = vmul.f32 %v6756_v15, %v3516_v53  ;;  %v3519_v25 = vadd.f32 %v5092_v35, %v3218_v11  ;;  %v3216_v26 = vadd.f32 %v3099_v6, %v6689_v49  ;;  %v5095_v44 = vpop.f32.mrf.mxu0 }
 0x266   : > { %v3879_v38 = vadd.f32 %v6764_v8, %v3824_v29  ;;  %v5045_v41 = vpop.f32.mrf.mxu1 }
 0x267   : > { %3970 = vst [vmem:[%s6774_s22 + $0xa8] sm:$0xff] %v3922_v32  ;;  %v3877_v50 = vadd.f32 %v6764_v8, %v3822_v37  ;;  %v3825_v19 = vmul.f32 %v6756_v15, %v3519_v25  ;;  %v3517_v4 = vadd.f32 %v3400_v62, %v3216_v26  ;;  %v3221_v47 = vadd.f32 %v5045_v41, %v6692_v17  ;;  %v3413_v0 = vpop.f32.mrf.mxu0 }
 0x268   : > { %v3927_v5 = vmax.f32 %v3879_v38, 0.0  ;;  %v3112_v54 = vpop.f32.mrf.mxu1 }
 0x269   : > { %v3925_v36 = vmax.f32 %v3877_v50, 0.0  ;;  %v3880_v49 = vadd.f32 %v6764_v8, %v3825_v19  ;;  %v3823_v18 = vmul.f32 %v6756_v15, %v3517_v4  ;;  %v3522_v43 = vadd.f32 %v5095_v44, %v3221_v47  ;;  %v5096_v23 = vpop.f32.mrf.mxu0 }
 0x26a   : > { %3975 = vst [vmem:[%s6774_s22 + $0xd0] sm:$0xff] %v3927_v5  ;;  %v3219_v33 = vadd.f32 %v3112_v54, %v6695_v59  ;;  %v5046_v48 = vpop.f32.mrf.mxu1 }
 0x26b   : > { %3973 = vst [vmem:[%s6774_s22 + $0xc0] sm:$0xff] %v3925_v36  ;;  %v3928_v56 = vmax.f32 %v3880_v49, 0.0  ;;  %v3878_v17 = vadd.f32 %v6764_v8, %v3823_v18  ;;  %v3828_v3 = vmul.f32 %v6756_v15, %v3522_v43  ;;  %v3222_v61 = vadd.f32 %v5046_v48, %v6698_v22  ;;  %v3416_v30 = vpop.f32.mrf.mxu0 }
 0x26c   : > { %v3520_v14 = vadd.f32 %v3413_v0, %v3219_v33  ;;  %v3115_v28 = vpop.f32.mrf.mxu1 }
 0x26d   : > { %3976 = vst [vmem:[%s6774_s22 + $0xd8] sm:$0xff] %v3928_v56  ;;  %v3926_v40 = vmax.f32 %v3878_v17, 0.0  ;;  %v3883_v24 = vadd.f32 %v6764_v8, %v3828_v3  ;;  %v3523_v45 = vadd.f32 %v5096_v23, %v3222_v61  ;;  %v3220_v59 = vadd.f32 %v3115_v28, %v6701_v51  ;;  %v5099_v34 = vpop.f32.mrf.mxu0 }
 0x26e   : > { %v3826_v20 = vmul.f32 %v6756_v15, %v3520_v14  ;;  %v5049_v60 = vpop.f32.mrf.mxu1 }
 0x26f   : > { %3974 = vst [vmem:[%s6774_s22 + $0xc8] sm:$0xff] %v3926_v40  ;;  %v3931_v13 = vmax.f32 %v3883_v24, 0.0  ;;  %v3829_v42 = vmul.f32 %v6756_v15, %v3523_v45  ;;  %v3521_v22 = vadd.f32 %v3416_v30, %v3220_v59  ;;  %v3225_v35 = vadd.f32 %v5049_v60, %v6704_v57  ;;  %v3429_v1 = vpop.f32.mrf.mxu0 }
 0x270   : > { %v3881_v10 = vadd.f32 %v6764_v8, %v3826_v20  ;;  %v3128_v39 = vpop.f32.mrf.mxu1 }
 0x271   : > { %3979 = vst [vmem:[%s6774_s22 + $0xf0] sm:$0xff] %v3931_v13  ;;  %v3884_v51 = vadd.f32 %v6764_v8, %v3829_v42  ;;  %v3827_v55 = vmul.f32 %v6756_v15, %v3521_v22  ;;  %v3526_v53 = vadd.f32 %v5099_v34, %v3225_v35  ;;  %v3223_v11 = vadd.f32 %v3128_v39, %v6707_v12  ;;  %v5100_v62 = vpop.f32.mrf.mxu0 }
 0x272   : > { %v3929_v29 = vmax.f32 %v3881_v10, 0.0  ;;  %v5050_v6 = vpop.f32.mrf.mxu1 }
 0x273   : > { %v3932_v32 = vmax.f32 %v3884_v51, 0.0  ;;  %v3882_v57 = vadd.f32 %v6764_v8, %v3827_v55  ;;  %v3832_v37 = vmul.f32 %v6756_v15, %v3526_v53  ;;  %v3524_v25 = vadd.f32 %v3429_v1, %v3223_v11  ;;  %v3432_v26 = vpop.f32.mrf.mxu0 }
 0x274   : > { %3977 = vst [vmem:[%s6774_s22 + $0xe0] sm:$0xff] %v3929_v29  ;;  %v3226_v44 = vadd.f32 %v5050_v6, %v6710_v16  ;;  %v3131_v38 = vpop.f32.mrf.mxu1 }
 0x275   : > { %3980 = vst [vmem:[%s6774_s22 + $0xf8] sm:$0xff] %v3932_v32  ;;  %v3930_v41 = vmax.f32 %v3882_v57, 0.0  ;;  %v3887_v12 = vadd.f32 %v6764_v8, %v3832_v37  ;;  %v3830_v50 = vmul.f32 %v6756_v15, %v3524_v25  ;;  %v3224_v19 = vadd.f32 %v3131_v38, %v6713_v2  ;;  %v5103_v4 = vpop.f32.mrf.mxu0 }
 0x276   : > { %v3527_v47 = vadd.f32 %v5100_v62, %v3226_v44  ;;  %v5053_v0 = vpop.f32.mrf.mxu1 }
 0x277   : > { %3978 = vst [vmem:[%s6774_s22 + $0xe8] sm:$0xff] %v3930_v41  ;;  %v3935_v5 = vmax.f32 %v3887_v12, 0.0  ;;  %v3885_v54 = vadd.f32 %v6764_v8, %v3830_v50  ;;  %v3525_v36 = vadd.f32 %v3432_v26, %v3224_v19  ;;  %v3229_v16 = vadd.f32 %v5053_v0, %v6716_v31  ;;  %v3445_v49 = vpop.f32.mrf.mxu0 }
 0x278   : > { %v3833_v18 = vmul.f32 %v6756_v15, %v3527_v47  ;;  %v3144_v43 = vpop.f32.mrf.mxu1 }
 0x279   : > { %3983 = vst [vmem:[%s6774_s22 + $0x110] sm:$0xff] %v3935_v5  ;;  %v3933_v23 = vmax.f32 %v3885_v54, 0.0  ;;  %v3831_v33 = vmul.f32 %v6756_v15, %v3525_v36  ;;  %v3530_v2 = vadd.f32 %v5103_v4, %v3229_v16  ;;  %v3227_v48 = vadd.f32 %v3144_v43, %v6719_v58  ;;  %v5104_v56 = vpop.f32.mrf.mxu0 }
 0x27a   : > { %v3888_v17 = vadd.f32 %v6764_v8, %v3833_v18  ;;  %v5054_v3 = vpop.f32.mrf.mxu1  ;;  %v7192_v18 = vld [vmem:[#allocation20_spill] sm:$0xff] }
 0x27b   : > { %3981 = vst [vmem:[%s6774_s22 + $0x100] sm:$0xff] %v3933_v23  ;;  %v3886_v31 = vadd.f32 %v6764_v8, %v3831_v33  ;;  %v3836_v61 = vmul.f32 %v6756_v15, %v3530_v2  ;;  %v3528_v30 = vadd.f32 %v3445_v49, %v3227_v48  ;;  %v3230_v14 = vadd.f32 %v5054_v3, %v6722_v9  ;;  %v3448_v28 = vpop.f32.mrf.mxu0 }
 0x27c   : > { %v3936_v40 = vmax.f32 %v3888_v17, 0.0  ;;  %v3147_v24 = vpop.f32.mrf.mxu1 }
 0x27d   : > { %v3934_v45 = vmax.f32 %v3886_v31, 0.0  ;;  %v3891_v58 = vadd.f32 %v6764_v8, %v3836_v61  ;;  %v3834_v59 = vmul.f32 %v6756_v15, %v3528_v30  ;;  %v3531_v34 = vadd.f32 %v5104_v56, %v3230_v14  ;;  %v5107_v20 = vpop.f32.mrf.mxu0 }
 0x27e   : > { %3984 = vst [vmem:[%s6774_s22 + $0x118] sm:$0xff] %v3936_v40  ;;  %v3228_v60 = vadd.f32 %v3147_v24, %v6725_v46  ;;  %v5057_v13 = vpop.f32.mrf.mxu1  ;;  %v7194_v40 = vld [vmem:[#allocation34_spill] sm:$0xff] }
 0x27f   : > { %3982 = vst [vmem:[%s6774_s22 + $0x108] sm:$0xff] %v3934_v45  ;;  %v3939_v42 = vmax.f32 %v3891_v58, 0.0  ;;  %v3889_v9 = vadd.f32 %v6764_v8, %v3834_v59  ;;  %v3837_v22 = vmul.f32 %v6756_v15, %v3531_v34  ;;  %v3233_v35 = vadd.f32 %v5057_v13, %v6728_v52  ;;  %v3461_v1 = vpop.f32.mrf.mxu0 }
 0x280   : > { %v3529_v10 = vadd.f32 %v3448_v28, %v3228_v60  ;;  %v3160_v39 = vpop.f32.mrf.mxu1 }
 0x281   : > { %3987 = vst [vmem:[%s6774_s22 + $0x130] sm:$0xff] %v3939_v42  ;;  %v3937_v51 = vmax.f32 %v3889_v9, 0.0  ;;  %v3892_v55 = vadd.f32 %v6764_v8, %v3837_v22  ;;  %v3534_v53 = vadd.f32 %v5107_v20, %v3233_v35  ;;  %v3231_v46 = vadd.f32 %v3160_v39, %v6731_v21  ;;  %v5108_v11 = vpop.f32.mrf.mxu0 }
 0x282   : > { %v3835_v62 = vmul.f32 %v6756_v15, %v3529_v10  ;;  %v5058_v29 = vpop.f32.mrf.mxu1 }
 0x283   : > { %3985 = vst [vmem:[%s6774_s22 + $0x120] sm:$0xff] %v3937_v51  ;;  %v3940_v6 = vmax.f32 %v3892_v55, 0.0  ;;  %v3840_v32 = vmul.f32 %v6756_v15, %v3534_v53  ;;  %v3532_v52 = vadd.f32 %v3461_v1, %v3231_v46  ;;  %v3234_v57 = vadd.f32 %v5058_v29, %v6734_v7  ;;  %v3464_v37 = vpop.f32.mrf.mxu0 }
 0x284   : > { %v3890_v25 = vadd.f32 %v6764_v8, %v3835_v62  ;;  %v3163_v26 = vpop.f32.mrf.mxu1 }
 0x285   : > { %3988 = vst [vmem:[%s6774_s22 + $0x138] sm:$0xff] %v3940_v6  ;;  %v3895_v21 = vadd.f32 %v6764_v8, %v3840_v32  ;;  %v3838_v44 = vmul.f32 %v6756_v15, %v3532_v52  ;;  %v3535_v38 = vadd.f32 %v5108_v11, %v3234_v57  ;;  %v3232_v41 = vadd.f32 %v3163_v26, %v6737_v63  ;;  %v5111_v12 = vpop.f32.mrf.mxu0 }
 0x286   : > { %v3938_v50 = vmax.f32 %v3890_v25, 0.0  ;;  %v5061_v19 = vpop.f32.mrf.mxu1 }
 0x287   : > { %v3943_v4 = vmax.f32 %v3895_v21, 0.0  ;;  %v3893_v7 = vadd.f32 %v6764_v8, %v3838_v44  ;;  %v3841_v47 = vmul.f32 %v6756_v15, %v3535_v38  ;;  %v3533_v0 = vadd.f32 %v3464_v37, %v3232_v41  ;;  %v3477_v5 = vpop.f32.mrf.mxu0 }
 0x288   : > { %3986 = vst [vmem:[%s6774_s22 + $0x128] sm:$0xff] %v3938_v50  ;;  %v3237_v54 = vadd.f32 %v5061_v19, %v6740_v27  ;;  %v3176_v36 = vpop.f32.mrf.mxu1  ;;  %v7193_v27 = vld [vmem:[#allocation33_spill] sm:$0xff] }
 0x289   : > { %3991 = vst [vmem:[%s6774_s22 + $0x150] sm:$0xff] %v3943_v4  ;;  %v3941_v16 = vmax.f32 %v3893_v7, 0.0  ;;  %v3896_v63 = vadd.f32 %v6764_v8, %v3841_v47  ;;  %v3839_v49 = vmul.f32 %v6756_v15, %v3533_v0  ;;  %v3235_v43 = vadd.f32 %v3176_v36, %v7192_v18  ;;  %v5112_v2 = vpop.f32.mrf.mxu0 }
 0x28a   : > { %v3538_v23 = vadd.f32 %v5111_v12, %v3237_v54  ;;  %v5062_v33 = vpop.f32.mrf.mxu1 }
 0x28b   : > { %3989 = vst [vmem:[%s6774_s22 + $0x140] sm:$0xff] %v3941_v16  ;;  %v3944_v48 = vmax.f32 %v3896_v63, 0.0  ;;  %v3894_v56 = vadd.f32 %v6764_v8, %v3839_v49  ;;  %v3536_v17 = vadd.f32 %v3477_v5, %v3235_v43  ;;  %v3238_v3 = vadd.f32 %v5062_v33, %v7193_v27  ;;  %v3480_v58 = vpop.f32.mrf.mxu0 }
 0x28c   : > { %v3844_v31 = vmul.f32 %v6756_v15, %v3538_v23  ;;  %v3179_v61 = vpop.f32.mrf.mxu1 }
 0x28d   : > { %3992 = vst [vmem:[%s6774_s22 + $0x158] sm:$0xff] %v3944_v48  ;;  %v3942_v30 = vmax.f32 %v3894_v56, 0.0  ;;  %v3842_v14 = vmul.f32 %v6756_v15, %v3536_v17  ;;  %v3539_v28 = vadd.f32 %v5112_v2, %v3238_v3  ;;  %v3236_v24 = vadd.f32 %v3179_v61, %v7194_v40 }
 0x28e   : > { %v3899_v45 = vadd.f32 %v6764_v8, %v3844_v31 }
 0x28f   : > { %3990 = vst [vmem:[%s6774_s22 + $0x148] sm:$0xff] %v3942_v30  ;;  %v3897_v59 = vadd.f32 %v6764_v8, %v3842_v14  ;;  %v3845_v34 = vmul.f32 %v6756_v15, %v3539_v28  ;;  %v3537_v20 = vadd.f32 %v3480_v58, %v3236_v24 }
 0x290   : > { %v3947_v60 = vmax.f32 %v3899_v45, 0.0 }
 0x291   : > { %v3945_v13 = vmax.f32 %v3897_v59, 0.0  ;;  %v3900_v42 = vadd.f32 %v6764_v8, %v3845_v34  ;;  %v3843_v9 = vmul.f32 %v6756_v15, %v3537_v20 }
 0x292   : > { %3995 = vst [vmem:[%s6774_s22 + $0x170] sm:$0xff] %v3947_v60 }
 0x293   : > { %3993 = vst [vmem:[%s6774_s22 + $0x160] sm:$0xff] %v3945_v13  ;;  %v3948_v22 = vmax.f32 %v3900_v42, 0.0  ;;  %v3898_v35 = vadd.f32 %v6764_v8, %v3843_v9 }
 0x295   : > { %3996 = vst [vmem:[%s6774_s22 + $0x178] sm:$0xff] %v3948_v22  ;;  %v3946_v1 = vmax.f32 %v3898_v35, 0.0 }
 0x297   : > { %3994 = vst [vmem:[%s6774_s22 + $0x168] sm:$0xff] %v3946_v1 }
 0x298   : > { %5264 = shalt.err (!%p5261_p5)
}
 0x299   : > { %s5265_s10 = scalar_lea.hbm %s6961_s5, 6144  ;;  %s5269_s13 = scalar_lea.hbm %s7018_s4, 12288 }
 0x29a   : > { %p5266_p6 = scmp.ne.s32.totalorder %s6961_s5, %s5265_s10  ;;  %p5270_p10 = scmp.lt.s32.totalorder %s6961_s5, %s7018_s4 }
 0x29b   : > { %p5271_p11 = scmp.lt.s32.totalorder %s5269_s13, %s5265_s10 }
 0x29c   : > { %p5267_p7 = pnand %p5266_p6, %p5397_p4 }
 0x29d   : > { %p5272_p12 = por %p5271_p11, %p5270_p10 }
 0x29e   : > { %p5268_p9 = pneg %p5267_p7 }
 0x2a0   : > { %p5273_p13 = pnand %p5272_p12, %p5268_p9 }
 0x2a2   : > { %5276 = shalt.err (!%p5273_p13)
}
 0x2a3   : > { %s5330_s22 = smov 128   ;;  %s5331_s24 = smov 8  }
 0x2a4   : > { %5128 = dma.vmem_to_hbm [thread:$0]  (%p5397_p4), %s6963_s26, 6144, %s6961_s5, %s6969_s18, %s5330_s22, %s5330_s22, %s5331_s24  }
 0x2a5 PF: > { %p5134_p0 = scmp.ge.s32.totalorder %s5327_s20, 2  ;;  %s4027_s29 = sand.u32 1, %s5307_s15  }
 0x2a6   : > { %s4028_s30 = scalar_lea.sflag [#allocation3], %s4027_s29 }
 0x2a7   : > { %p5131_p1 = pnand %p5134_p0, %p5404_p8 }
 0x2a9   : > { %p5132_p2 = pneg %p5131_p1 }
 0x2ab   : > { %5302 = dma.done.wait (%p5132_p2), %s4028_s30, 6144  }
 0x2ac   : > { %5304 = vsyncadd (%p5132_p2), %s4028_s30, 4294961152  ;;  %s17_s20 = sadd.s32 1, %s5327_s20   ;;  %s7195_s15 = smov %s5311_s16 }
 0x2ad   : > { %p14_p3 = scmp.ge.s32.totalorder %s17_s20, 4   ;;  %s7196_s16 = smov %s5315_s17 }
 0x2ae   : > { %s7197_s17 = smov %s5410_s28  ;;  %s7198_s18 = smov %s5323_s19 }
 0x2af   : > { %s7199_s19 = smov %s7201_s23  ;;  %16 = sbr.rel (!%p14_p3) target bundleno = 4 (0x4), region = 100 }
 0x2b4   :  { %4033 = vsyncpa [#allocation3], 1 }
 0x2b5   :  { %4035 = vsyncpa [#allocation3 + $0x1], 1 }

</bundles_post_ra>
